<compile_context>
chip_gen: v5e
topology: v5e:2x2
jax: 0.10.0
libtpu: 0.0.40
codegen_flags: <defaults>
</compile_context>

<pallas_src>
import jax
import jax.numpy as jnp
import numpy as np
from jax.experimental import pallas as pl
from jax.experimental.pallas import tpu as pltpu


_VMEM_LIMIT_BYTES = 32 * 1024 * 1024   # explicit scoped-VMEM limit (fits v5e/v6e/v7x)
_VMEM_TILE_BUDGET = 24 * 1024 * 1024   # streamed-tile budget (resident weight subtracted)
_WEIGHT_BUDGET = 8 * 1024 * 1024       # cap on resident (double-buffered) packed weight
_MAX_OUT_LANES = 128                   # grouped output width stays within one MXU tile
_MAX_TILE_ROWS = 4096                  # cap on (grouped) rows per grid step


def _cdiv(a, b):
    return -(-a // b)


def _round_up(x, m):
    return _cdiv(x, m) * m


def _sublane_multiple(itemsize):
    # f32 -> 8, bf16 -> 16, int8/fp8 -> 32
    return max(8, 32 // itemsize)


# ---------------------------------------------------------------------------
# Kernel body: one MXU push per tile, f32 accumulation, cast on store.
# ---------------------------------------------------------------------------
def _linear_kernel(x_ref, w_ref, b_ref, o_ref):
    # x: (TM, Kg)   w: (Kg, Lg)   b: (1, Lg)   o: (TM, Lg)
    y = jnp.dot(x_ref[...], w_ref[...], preferred_element_type=jnp.float32)
    o_ref[...] = (y + b_ref[...].astype(jnp.float32)).astype(o_ref.dtype)


# ---------------------------------------------------------------------------
# Tiling / grouping heuristics
# ---------------------------------------------------------------------------
def _pick_tile_rows(n_rows, in_lanes, out_lanes, itemsize, *,
                    max_tile_rows=_MAX_TILE_ROWS,
                    budget=_VMEM_TILE_BUDGET,
                    resident_bytes=0):
    """Largest row-tile whose double-buffered, lane-PADDED in+out tiles fit."""
    sub = _sublane_multiple(itemsize)
    kp = _round_up(in_lanes, 128)
    lp = _round_up(out_lanes, 128)
    per_row = (kp + lp) * itemsize * 2              # double-buffered in + out
    avail = max(budget - resident_bytes, per_row * sub)
    cap = min(max_tile_rows, avail // per_row)
    if cap >= n_rows:
        tile = n_rows                               # single full block is legal
    else:
        tile = max(sub, (cap // sub) * sub)
    # Keep at least 2 grid blocks when possible so the "parallel" grid axis
    # actually feeds both TensorCores on v7x.
    if n_rows >= 2 * sub:
        tile = min(tile, _round_up(_cdiv(n_rows, 2), sub))
    return int(tile)


def _pick_group(n_rows, out_cols, in_cols, itemsize):
    """Largest G with G*out_cols <= 128, G | n_rows, >= one sublane tile of
    grouped rows, and the resident packed weight within budget."""
    sub = _sublane_multiple(itemsize)
    gmax = max(1, _MAX_OUT_LANES // max(out_cols, 1))
    gmax = min(gmax, max(1, _WEIGHT_BUDGET // max(in_cols * 128 * itemsize * 2, 1)))
    gmax = min(gmax, n_rows)
    min_rows = min(n_rows, sub)
    for g in range(gmax, 0, -1):
        if n_rows % g == 0 and n_rows // g >= min_rows:
            return g
    return 1


# ---------------------------------------------------------------------------
# Shared tiled-linear pallas_call
# ---------------------------------------------------------------------------
def _tiled_linear(x2d, w2d, b2d, out_dtype, tile_rows):
    n, k = x2d.shape
    l = w2d.shape[1]
    x_isz = jnp.dtype(x2d.dtype).itemsize
    w_isz = jnp.dtype(w2d.dtype).itemsize
    o_isz = jnp.dtype(out_dtype).itemsize
    cost = pl.CostEstimate(
        flops=2 * n * k * l,
        transcendentals=0,
        bytes_accessed=n * k * x_isz + k * l * w_isz + l * w_isz + n * l * o_isz,
    )
    return pl.pallas_call(
        _linear_kernel,
        out_shape=jax.ShapeDtypeStruct((n, l), out_dtype),
        grid=(pl.cdiv(n, tile_rows),),
        in_specs=[
            pl.BlockSpec((tile_rows, k), lambda i: (i, 0)),   # streamed activations
            pl.BlockSpec((k, l), lambda i: (0, 0)),           # resident packed weight
            pl.BlockSpec((1, l), lambda i: (0, 0)),           # resident packed bias
        ],
        out_specs=pl.BlockSpec((tile_rows, l), lambda i: (i, 0)),
        compiler_params=pltpu.CompilerParams(
            dimension_semantics=("parallel",),                # megacore split on v7x
            vmem_limit_bytes=_VMEM_LIMIT_BYTES,
        ),
        cost_estimate=cost,
    )(x2d, w2d, b2d)


# ---------------------------------------------------------------------------
# Weight packing (hoist these out of the per-step hot path)
# ---------------------------------------------------------------------------
def pack_postag_params(weight_CT, bias_CT, n_rows):
    """POSTag: block-diagonal over cells, then grouped G token-rows/step."""
    C, H = weight_CT.shape
    eye_c = jnp.eye(C, dtype=weight_CT.dtype)
    # W_bd[c*H + h, c2] = weight_CT[c, h] * (c == c2)
    w_bd = (weight_CT[:, :, None] * eye_c[:, None, :]).reshape(C * H, C)
    b2d = bias_CT.reshape(1, C)
    g = _pick_group(n_rows, C, C * H, jnp.dtype(weight_CT.dtype).itemsize)
    if g > 1:
        w_bd = jnp.kron(jnp.eye(g, dtype=w_bd.dtype), w_bd)
        b2d = jnp.tile(b2d, (1, g))
    return w_bd, b2d, g


def pack_ner_params(weights, biases, n_rows):
    """NER: per-entity Linear packed block-diagonally, [:, :, 2:] folded in,
    then grouped G token-rows/step."""
    E, P, H = weights.shape
    L = E * P - 2
    eye_e = jnp.eye(E, dtype=weights.dtype)
    # W_bd[e*H + h, e2*P + p] = weights[e, p, h] * (e == e2)
    w_bd = (jnp.transpose(weights, (0, 2, 1))[:, :, None, :]
            * eye_e[:, None, :, None]).reshape(E * H, E * P)
    w_bd = w_bd[:, 2:]                               # fold torch's [:, :, 2:]
    b2d = biases.reshape(E * P)[2:].reshape(1, L)
    g = _pick_group(n_rows, L, E * H, jnp.dtype(weights.dtype).itemsize)
    if g > 1:
        w_bd = jnp.kron(jnp.eye(g, dtype=w_bd.dtype), w_bd)
        b2d = jnp.tile(b2d, (1, g))
    return w_bd, b2d, g


# ---------------------------------------------------------------------------
# Forward passes (equivalent to Cell_to_Tag.forward)
# ---------------------------------------------------------------------------
def cell_to_tag_postag(hidden_outputs, weight_CT=None, bias_CT=None, *, packed=None):
    B, S, C, H = hidden_outputs.shape
    N = B * S
    if packed is None:
        packed = pack_postag_params(weight_CT, bias_CT, N)
    w_big, b_big, g = packed
    L = w_big.shape[1] // g
    assert L == C, "POSTag path requires cell_num == label_num"
    assert N % g == 0 and w_big.shape == (g * C * H, g * L)
    x2d = hidden_outputs.reshape(N // g, g * C * H)          # contiguous -> free
    itemsize = jnp.dtype(hidden_outputs.dtype).itemsize
    resident = (g * C * H) * _round_up(g * L, 128) * jnp.dtype(w_big.dtype).itemsize * 2
    tile = _pick_tile_rows(N // g, g * C * H, g * L, itemsize, resident_bytes=resident)
    out = _tiled_linear(x2d, w_big, b_big, hidden_outputs.dtype, tile)
    return out.reshape(B, S, L)


def cell_to_tag_ner(hidden_outputs, weights=None, biases=None, *, packed=None):
    B, S, E, H = hidden_outputs.shape
    N = B * S
    if packed is None:
        packed = pack_ner_params(weights, biases, N)
    w_big, b_big, g = packed
    assert w_big.shape[0] == g * E * H, "NER path indexes one cell per entity"
    L = w_big.shape[1] // g
    assert N % g == 0
    x2d = hidden_outputs.reshape(N // g, g * E * H)          # contiguous -> free
    itemsize = jnp.dtype(hidden_outputs.dtype).itemsize
    resident = (g * E * H) * _round_up(g * L, 128) * jnp.dtype(w_big.dtype).itemsize * 2
    tile = _pick_tile_rows(N // g, g * E * H, g * L, itemsize, resident_bytes=resident)
    out = _tiled_linear(x2d, w_big, b_big, hidden_outputs.dtype, tile)
    return out.reshape(B, S, L)


if __name__ == "__main__":
    key = jax.random.PRNGKey(0)
    B, S, H = 2, 64, 32          # N = 128 token-rows: small, but lets grouping/tiling engage

    # ------------------- POSTag (cell_num == label_num == 8) ---------------
    label_num = 8
    k1, k2, k3, k4, k5 = jax.random.split(key, 5)
    x_pos = jax.random.normal(k1, (B, S, label_num, H), jnp.float32)
    w_ct = jax.random.normal(k2, (label_num, H), jnp.float32) * 0.1
    b_ct = jax.random.normal(k3, (label_num,), jnp.float32) * 0.1

    packed_pos = pack_postag_params(w_ct, b_ct, B * S)       # hoisted out of hot path
    y_pos = jax.block_until_ready(cell_to_tag_postag(x_pos, packed=packed_pos))
    ref_pos = jnp.einsum("bsch,ch->bsc", x_pos, w_ct) + b_ct[None, None, :]
    assert y_pos.shape == (B, S, label_num)
    np.testing.assert_allclose(np.asarray(y_pos), np.asarray(ref_pos),
                               rtol=1e-5, atol=1e-5)

    # Convenience (unpacked) path should agree.
    y_pos2 = jax.block_until_ready(cell_to_tag_postag(x_pos, w_ct, b_ct))
    np.testing.assert_allclose(np.asarray(y_pos2), np.asarray(ref_pos),
                               rtol=1e-5, atol=1e-5)

    # ------------------- NER (entity_num=4, pos_num=5, label_num=18) -------
    entity_num, pos_num = 4, 5
    x_ner = jax.random.normal(k4, (B, S, entity_num, H), jnp.float32)
    kw, kb = jax.random.split(k5)
    w_ner = jax.random.normal(kw, (entity_num, pos_num, H), jnp.float32) * 0.1
    b_ner = jax.random.normal(kb, (entity_num, pos_num), jnp.float32) * 0.1

    packed_ner = pack_ner_params(w_ner, b_ner, B * S)
    y_ner = jax.block_until_ready(cell_to_tag_ner(x_ner, packed=packed_ner))
    ref_ner = (jnp.einsum("bseh,eph->bsep", x_ner, w_ner)
               + b_ner[None, None]).reshape(B, S, -1)[:, :, 2:]
    assert y_ner.shape == (B, S, entity_num * pos_num - 2)
    np.testing.assert_allclose(np.asarray(y_ner), np.asarray(ref_ner),
                               rtol=1e-5, atol=1e-5)

    print("KERNEL_OK")
</pallas_src>

<mosaic_0001>
module attributes {stable_mosaic.version = 11 : i64} {
  func.func @_linear_kernel(%arg0: i32, %arg1: memref<8x4096xf32, #tpu.memory_space<vmem>>, %arg2: memref<4096x128xf32, #tpu.memory_space<vmem>>, %arg3: memref<1x128xf32, #tpu.memory_space<vmem>>, %arg4: memref<8x128xf32, #tpu.memory_space<vmem>>) attributes {dimension_semantics = [#tpu.dimension_semantics<parallel>], iteration_bounds = array<i64: 1>, scalar_prefetch = 0 : i64, scratch_operands = 0 : i64, tpu.core_type = #tpu.core_type<tc>, window_params = [{transform_indices = @transform_0, window_bounds = array<i64: 8, 4096>}, {pipeline_mode = #tpu.pipeline_mode<synchronous>, transform_indices = @transform_1, window_bounds = array<i64: 4096, 128>}, {pipeline_mode = #tpu.pipeline_mode<synchronous>, transform_indices = @transform_2, window_bounds = array<i64: 1, 128>}, {transform_indices = @transform_3, window_bounds = array<i64: 8, 128>}]} {
    %c0 = arith.constant 0 : index
    %c0_0 = arith.constant 0 : index
    %0 = vector.load %arg1[%c0, %c0_0] : memref<8x4096xf32, #tpu.memory_space<vmem>>, vector<8x4096xf32>
    %c0_1 = arith.constant 0 : index
    %c0_2 = arith.constant 0 : index
    %1 = vector.load %arg2[%c0_1, %c0_2] : memref<4096x128xf32, #tpu.memory_space<vmem>>, vector<4096x128xf32>
    %cst = arith.constant dense<0.000000e+00> : vector<8x128xf32>
    %2 = tpu.matmul %0, %1, %cst {dimension_numbers = #tpu.dot_dimension_numbers<[1], [0], [0], [1], [0, 0, 1, 1], [], []>} : vector<8x4096xf32>, vector<4096x128xf32>, vector<8x128xf32> -> vector<8x128xf32>
    %c0_3 = arith.constant 0 : index
    %c0_4 = arith.constant 0 : index
    %3 = vector.load %arg3[%c0_3, %c0_4] : memref<1x128xf32, #tpu.memory_space<vmem>>, vector<1x128xf32>
    %4 = vector.broadcast %3 : vector<1x128xf32> to vector<8x128xf32>
    %5 = arith.addf %2, %4 : vector<8x128xf32>
    %c0_5 = arith.constant 0 : index
    %c0_6 = arith.constant 0 : index
    %6 = vector.load %arg4[%c0_5, %c0_6] : memref<8x128xf32, #tpu.memory_space<vmem>>, vector<8x128xf32>
    tpu.vector_store %arg4[%c0_5, %c0_6], %5 {strides = array<i32>} : memref<8x128xf32, #tpu.memory_space<vmem>>, vector<8x128xf32>,
    return
  }
  func.func @transform_0(%arg0: i32) -> (i32, i32) {
    %c0_i32 = arith.constant 0 : i32
    %c0_i32_0 = arith.constant 0 : i32
    return %arg0, %c0_i32 : i32, i32
  }
  func.func @transform_1(%arg0: i32) -> (i32, i32) {
    %c0_i32 = arith.constant 0 : i32
    %c0_i32_0 = arith.constant 0 : i32
    %c0_i32_1 = arith.constant 0 : i32
    return %c0_i32, %c0_i32_0 : i32, i32
  }
  func.func @transform_2(%arg0: i32) -> (i32, i32) {
    %c0_i32 = arith.constant 0 : i32
    %c0_i32_0 = arith.constant 0 : i32
    %c0_i32_1 = arith.constant 0 : i32
    return %c0_i32, %c0_i32_0 : i32, i32
  }
  func.func @transform_3(%arg0: i32) -> (i32, i32) {
    %c0_i32 = arith.constant 0 : i32
    %c0_i32_0 = arith.constant 0 : i32
    return %arg0, %c0_i32 : i32, i32
  }
}

</mosaic_0001>

<bundles_post_ra>
// kernel: tpu_custom_call.1
= control target key start
LH: loop header
LB: loop body
LE: loop exit
PB: predicated region body
PF: predicated region fallthrough
CT: control target
= control target key end

     0   :  { %8 = vsyncpa [#allocation3], 0  ;;  %s1412_s0 = inlined_call_operand.hbm [shape: f32[8,4096], index: 0, kind: input, shape index: {}]   ;;  %s1413_s1 = inlined_call_operand.hbm [shape: f32[4096,128], index: 1, kind: input, shape index: {}]   ;;  %s1414_s2 = inlined_call_operand.hbm [shape: f32[1,128], index: 2, kind: input, shape index: {}]   ;;  %s1415_s3 = inlined_call_operand.hbm [shape: f32[8,128], index: 3, kind: output, shape index: {}]  }
   0x1   :  { %9 = vsyncpa [#allocation6], 0  ;;  %s26_s14 = sshll.u32 %s1413_s1, 4  ;;  %s27_s14 = int_to_ptr.hbm [resolvable:$true] %s26_s14 }
   0x2   :  { %10 = vsyncpa [#allocation4], 0  ;;  %s1374_s15 = smov [#allocation5]   ;;  %s16_s19 = sshll.u32 %s1412_s0, 4  ;;  %s17_s19 = int_to_ptr.hbm [resolvable:$true] %s16_s19 }
   0x3   :  { %s28_s16 = sshll.u32 %s1374_s15, 4  ;;  %s1375_s20 = smov 128   ;;  %s29_s16 = int_to_ptr.vmem [resolvable:$true] %s28_s16 }
   0x4   :  { %s1376_s21 = smov 8   ;;  %s1377_s22 = smov [#allocation2]  }
   0x5   :  { %34 = dma.hbm_to_vmem [thread:$0]  %s27_s14, 65536, %s29_s16, [#allocation6], %s1375_s20, %s1375_s20, %s1376_s21  }
   0x6   :  { %s18_s23 = sshll.u32 %s1377_s22, 4  ;;  %s40_s26 = sshll.u32 %s1414_s2, 4  ;;  %s19_s23 = int_to_ptr.vmem [resolvable:$true] %s18_s23  ;;  %s41_s26 = int_to_ptr.hbm [resolvable:$true] %s40_s26 }
   0x7   :  { %21 = dma.hbm_to_vmem [thread:$0]  %s17_s19, 4096, %s19_s23, [#allocation3]  }
   0x8   :  { %s1378_s1 = smov [#allocation7]  }
   0x9   :  { %s42_s27 = sshll.u32 %s1378_s1, 4  ;;  %s43_s27 = int_to_ptr.vmem [resolvable:$true] %s42_s27 }
   0xa   :  { %45 = dma.hbm_to_vmem [thread:$0]  %s41_s26, 16, %s43_s27, [#allocation6]  }
   0xb   :  { %1368 = dma.done.wait [#allocation3], 4096  }
   0xc   :  { %1369 = vsyncadd [#allocation3], 4294963200 }
   0xd   :  { %1370 = dma.done.wait [#allocation6], 65552  }
   0xe   :  { %1371 = vsyncadd [#allocation6], 4294901744  ;;  %v105_v0 = vld [vmem:[#allocation5 + $0x78] sm:$0xff]  ;;  %v104_v2 = vld [vmem:[#allocation5 + $0x70] sm:$0xff]  ;;  %s1379_s0 = smov [#allocation8]   ;;  %s1254_s30 = sshll.u32 %s1415_s3, 4  ;;  %s1255_s30 = int_to_ptr.hbm [resolvable:$true] %s1254_s30 }
   0xf   :  { %v137_v1 = vld [vmem:[#allocation5 + $0x178] sm:$0xff]  ;;  %606 = vmatpush.msra.mxu0 %v105_v0  ;;  %v136_v4 = vld [vmem:[#allocation5 + $0x170] sm:$0xff]  ;;  %v103_v6 = vld [vmem:[#allocation5 + $0x68] sm:$0xff]  ;;  %s1252_s2 = sshll.u32 %s1379_s0, 4  ;;  %s1253_s2 = int_to_ptr.vmem [resolvable:$true] %s1252_s2 }
  0x10   :  { %646 = vmatpush.msra.mxu2 %v137_v1  ;;  %v121_v3 = vld [vmem:[#allocation5 + $0xf8] sm:$0xff]  ;;  %v120_v7 = vld [vmem:[#allocation5 + $0xf0] sm:$0xff]  ;;  %v135_v8 = vld [vmem:[#allocation5 + $0x168] sm:$0xff] }
  0x11   :  { %v153_v5 = vld [vmem:[#allocation5 + $0x1f8] sm:$0xff]  ;;  %626 = vmatpush.msra.mxu1 %v121_v3  ;;  %607 = vmatpush.msra.mxu0 %v104_v2  ;;  %v152_v9 = vld [vmem:[#allocation5 + $0x1f0] sm:$0xff]  ;;  %v119_v10 = vld [vmem:[#allocation5 + $0xe8] sm:$0xff] }
  0x12   :  { %666 = vmatpush.msra.mxu3 %v153_v5  ;;  %647 = vmatpush.msra.mxu2 %v136_v4  ;;  %v102_v11 = vld [vmem:[#allocation5 + $0x60] sm:$0xff]  ;;  %v151_v13 = vld [vmem:[#allocation5 + $0x1e8] sm:$0xff]  ;;  %v101_v16 = vld [vmem:[#allocation5 + $0x58] sm:$0xff] }
  0x13   :  { %627 = vmatpush.msra.mxu1 %v120_v7  ;;  %v134_v12 = vld [vmem:[#allocation5 + $0x160] sm:$0xff]  ;;  %608 = vmatpush.msra.mxu0 %v103_v6  ;;  %v133_v17 = vld [vmem:[#allocation5 + $0x158] sm:$0xff]  ;;  %v100_v20 = vld [vmem:[#allocation5 + $0x50] sm:$0xff] }
  0x14   :  { %667 = vmatpush.msra.mxu3 %v152_v9  ;;  %648 = vmatpush.msra.mxu2 %v135_v8  ;;  %v118_v14 = vld [vmem:[#allocation5 + $0xe0] sm:$0xff]  ;;  %v117_v18 = vld [vmem:[#allocation5 + $0xd8] sm:$0xff]  ;;  %v132_v21 = vld [vmem:[#allocation5 + $0x150] sm:$0xff] }
  0x15   :  { %v150_v15 = vld [vmem:[#allocation5 + $0x1e0] sm:$0xff]  ;;  %628 = vmatpush.msra.mxu1 %v119_v10  ;;  %609 = vmatpush.msra.mxu0 %v102_v11  ;;  %v149_v19 = vld [vmem:[#allocation5 + $0x1d8] sm:$0xff]  ;;  %v116_v22 = vld [vmem:[#allocation5 + $0xd0] sm:$0xff] }
  0x16   :  { %668 = vmatpush.msra.mxu3 %v151_v13  ;;  %649 = vmatpush.msra.mxu2 %v134_v12  ;;  %v148_v23 = vld [vmem:[#allocation5 + $0x1d0] sm:$0xff]  ;;  %v99_v24 = vld [vmem:[#allocation5 + $0x48] sm:$0xff]  ;;  %v98_v28 = vld [vmem:[#allocation5 + $0x40] sm:$0xff] }
  0x17   :  { %629 = vmatpush.msra.mxu1 %v118_v14  ;;  %610 = vmatpush.msra.mxu0 %v101_v16  ;;  %v131_v25 = vld [vmem:[#allocation5 + $0x148] sm:$0xff]  ;;  %v130_v29 = vld [vmem:[#allocation5 + $0x140] sm:$0xff]  ;;  %v97_v32 = vld [vmem:[#allocation5 + $0x38] sm:$0xff] }
  0x18   :  { %669 = vmatpush.msra.mxu3 %v150_v15  ;;  %650 = vmatpush.msra.mxu2 %v133_v17  ;;  %v115_v26 = vld [vmem:[#allocation5 + $0xc8] sm:$0xff]  ;;  %v114_v30 = vld [vmem:[#allocation5 + $0xc0] sm:$0xff]  ;;  %v129_v33 = vld [vmem:[#allocation5 + $0x138] sm:$0xff] }
  0x19   :  { %630 = vmatpush.msra.mxu1 %v117_v18  ;;  %611 = vmatpush.msra.mxu0 %v100_v20  ;;  %v147_v27 = vld [vmem:[#allocation5 + $0x1c8] sm:$0xff]  ;;  %v146_v31 = vld [vmem:[#allocation5 + $0x1c0] sm:$0xff]  ;;  %v113_v34 = vld [vmem:[#allocation5 + $0xb8] sm:$0xff] }
  0x1a   :  { %670 = vmatpush.msra.mxu3 %v149_v19  ;;  %651 = vmatpush.msra.mxu2 %v132_v21  ;;  %v145_v35 = vld [vmem:[#allocation5 + $0x1b8] sm:$0xff]  ;;  %v96_v36 = vld [vmem:[#allocation5 + $0x30] sm:$0xff]  ;;  %v95_v40 = vld [vmem:[#allocation5 + $0x28] sm:$0xff] }
  0x1b   :  { %631 = vmatpush.msra.mxu1 %v116_v22  ;;  %612 = vmatpush.msra.mxu0 %v99_v24  ;;  %v128_v37 = vld [vmem:[#allocation5 + $0x130] sm:$0xff]  ;;  %v127_v41 = vld [vmem:[#allocation5 + $0x128] sm:$0xff]  ;;  %v94_v44 = vld [vmem:[#allocation5 + $0x20] sm:$0xff] }
  0x1c   :  { %671 = vmatpush.msra.mxu3 %v148_v23  ;;  %652 = vmatpush.msra.mxu2 %v131_v25  ;;  %v112_v38 = vld [vmem:[#allocation5 + $0xb0] sm:$0xff]  ;;  %v111_v42 = vld [vmem:[#allocation5 + $0xa8] sm:$0xff]  ;;  %v126_v45 = vld [vmem:[#allocation5 + $0x120] sm:$0xff] }
  0x1d   :  { %632 = vmatpush.msra.mxu1 %v115_v26  ;;  %613 = vmatpush.msra.mxu0 %v98_v28  ;;  %v144_v39 = vld [vmem:[#allocation5 + $0x1b0] sm:$0xff]  ;;  %v143_v43 = vld [vmem:[#allocation5 + $0x1a8] sm:$0xff]  ;;  %v110_v46 = vld [vmem:[#allocation5 + $0xa0] sm:$0xff] }
  0x1e   :  { %672 = vmatpush.msra.mxu3 %v147_v27  ;;  %653 = vmatpush.msra.mxu2 %v130_v29  ;;  %v142_v47 = vld [vmem:[#allocation5 + $0x1a0] sm:$0xff]  ;;  %v93_v48 = vld [vmem:[#allocation5 + $0x18] sm:$0xff]  ;;  %v92_v52 = vld [vmem:[#allocation5 + $0x10] sm:$0xff] }
  0x1f   :  { %633 = vmatpush.msra.mxu1 %v114_v30  ;;  %614 = vmatpush.msra.mxu0 %v97_v32  ;;  %v125_v49 = vld [vmem:[#allocation5 + $0x118] sm:$0xff]  ;;  %v124_v53 = vld [vmem:[#allocation5 + $0x110] sm:$0xff]  ;;  %v91_v56 = vld [vmem:[#allocation5 + $0x8] sm:$0xff] }
  0x20   :  { %673 = vmatpush.msra.mxu3 %v146_v31  ;;  %654 = vmatpush.msra.mxu2 %v129_v33  ;;  %v109_v50 = vld [vmem:[#allocation5 + $0x98] sm:$0xff]  ;;  %v108_v54 = vld [vmem:[#allocation5 + $0x90] sm:$0xff]  ;;  %v123_v57 = vld [vmem:[#allocation5 + $0x108] sm:$0xff] }
  0x21   :  { %634 = vmatpush.msra.mxu1 %v113_v34  ;;  %615 = vmatpush.msra.mxu0 %v96_v36  ;;  %v141_v51 = vld [vmem:[#allocation5 + $0x198] sm:$0xff]  ;;  %v140_v55 = vld [vmem:[#allocation5 + $0x190] sm:$0xff]  ;;  %v107_v58 = vld [vmem:[#allocation5 + $0x88] sm:$0xff] }
  0x22   :  { %674 = vmatpush.msra.mxu3 %v145_v35  ;;  %655 = vmatpush.msra.mxu2 %v128_v37  ;;  %v139_v59 = vld [vmem:[#allocation5 + $0x188] sm:$0xff]  ;;  %v90_v60 = vld [vmem:[#allocation5] sm:$0xff]  ;;  %v169_v62 = vld [vmem:[#allocation5 + $0x278] sm:$0xff] }
  0x23   :  { %635 = vmatpush.msra.mxu1 %v112_v38  ;;  %616 = vmatpush.msra.mxu0 %v95_v40  ;;  %v122_v61 = vld [vmem:[#allocation5 + $0x100] sm:$0xff]  ;;  %v201_v63 = vld [vmem:[#allocation5 + $0x378] sm:$0xff]  ;;  %v168_v2 = vld [vmem:[#allocation5 + $0x270] sm:$0xff] }
  0x24   :  { %675 = vmatpush.msra.mxu3 %v144_v39  ;;  %656 = vmatpush.msra.mxu2 %v127_v41  ;;  %v106_v0 = vld [vmem:[#allocation5 + $0x80] sm:$0xff]  ;;  %v185_v3 = vld [vmem:[#allocation5 + $0x2f8] sm:$0xff]  ;;  %v200_v4 = vld [vmem:[#allocation5 + $0x370] sm:$0xff] }
  0x25   :  { %636 = vmatpush.msra.mxu1 %v111_v42  ;;  %617 = vmatpush.msra.mxu0 %v94_v44  ;;  %v138_v1 = vld [vmem:[#allocation5 + $0x180] sm:$0xff]  ;;  %v217_v5 = vld [vmem:[#allocation5 + $0x3f8] sm:$0xff]  ;;  %v167_v6 = vld [vmem:[#allocation5 + $0x268] sm:$0xff] }
  0x26   :  { %676 = vmatpush.msra.mxu3 %v143_v43  ;;  %657 = vmatpush.msra.mxu2 %v126_v45  ;;  %v184_v7 = vld [vmem:[#allocation5 + $0x2f0] sm:$0xff]  ;;  %v199_v8 = vld [vmem:[#allocation5 + $0x368] sm:$0xff]  ;;  %v166_v10 = vld [vmem:[#allocation5 + $0x260] sm:$0xff] }
  0x27   :  { %637 = vmatpush.msra.mxu1 %v110_v46  ;;  %618 = vmatpush.msra.mxu0 %v93_v48  ;;  %v216_v9 = vld [vmem:[#allocation5 + $0x3f0] sm:$0xff]  ;;  %v183_v11 = vld [vmem:[#allocation5 + $0x2e8] sm:$0xff]  ;;  %v198_v12 = vld [vmem:[#allocation5 + $0x360] sm:$0xff] }
  0x28   :  { %677 = vmatpush.msra.mxu3 %v142_v47  ;;  %658 = vmatpush.msra.mxu2 %v125_v49  ;;  %v215_v13 = vld [vmem:[#allocation5 + $0x3e8] sm:$0xff]  ;;  %v165_v14 = vld [vmem:[#allocation5 + $0x258] sm:$0xff]  ;;  %v182_v15 = vld [vmem:[#allocation5 + $0x2e0] sm:$0xff] }
  0x29   :  { %638 = vmatpush.msra.mxu1 %v109_v50  ;;  %619 = vmatpush.msra.mxu0 %v92_v52  ;;  %v197_v16 = vld [vmem:[#allocation5 + $0x358] sm:$0xff]  ;;  %v214_v17 = vld [vmem:[#allocation5 + $0x3e0] sm:$0xff]  ;;  %v164_v18 = vld [vmem:[#allocation5 + $0x250] sm:$0xff] }
  0x2a   :  { %678 = vmatpush.msra.mxu3 %v141_v51  ;;  %659 = vmatpush.msra.mxu2 %v124_v53  ;;  %v181_v19 = vld [vmem:[#allocation5 + $0x2d8] sm:$0xff]  ;;  %v196_v20 = vld [vmem:[#allocation5 + $0x350] sm:$0xff]  ;;  %v163_v22 = vld [vmem:[#allocation5 + $0x248] sm:$0xff] }
  0x2b   :  { %639 = vmatpush.msra.mxu1 %v108_v54  ;;  %620 = vmatpush.msra.mxu0 %v91_v56  ;;  %v213_v21 = vld [vmem:[#allocation5 + $0x3d8] sm:$0xff]  ;;  %v180_v23 = vld [vmem:[#allocation5 + $0x2d0] sm:$0xff]  ;;  %v195_v24 = vld [vmem:[#allocation5 + $0x348] sm:$0xff] }
  0x2c   :  { %679 = vmatpush.msra.mxu3 %v140_v55  ;;  %660 = vmatpush.msra.mxu2 %v123_v57  ;;  %v212_v25 = vld [vmem:[#allocation5 + $0x3d0] sm:$0xff]  ;;  %v162_v26 = vld [vmem:[#allocation5 + $0x240] sm:$0xff]  ;;  %v179_v27 = vld [vmem:[#allocation5 + $0x2c8] sm:$0xff] }
  0x2d   :  { %640 = vmatpush.msra.mxu1 %v107_v58  ;;  %621 = vmatpush.msra.mxu0 %v90_v60  ;;  %v194_v28 = vld [vmem:[#allocation5 + $0x340] sm:$0xff]  ;;  %v211_v29 = vld [vmem:[#allocation5 + $0x3c8] sm:$0xff]  ;;  %v161_v30 = vld [vmem:[#allocation5 + $0x238] sm:$0xff] }
  0x2e   :  { %680 = vmatpush.msra.mxu3 %v139_v59  ;;  %661 = vmatpush.msra.mxu2 %v122_v61  ;;  %v178_v31 = vld [vmem:[#allocation5 + $0x2c0] sm:$0xff]  ;;  %v193_v32 = vld [vmem:[#allocation5 + $0x338] sm:$0xff]  ;;  %v160_v34 = vld [vmem:[#allocation5 + $0x230] sm:$0xff] }
  0x2f   :  { %686 = vmatpush.msrb.mxu0 %v169_v62  ;;  %641 = vmatpush.msra.mxu1 %v106_v0  ;;  %v210_v33 = vld [vmem:[#allocation5 + $0x3c0] sm:$0xff]  ;;  %v177_v35 = vld [vmem:[#allocation5 + $0x2b8] sm:$0xff]  ;;  %v192_v36 = vld [vmem:[#allocation5 + $0x330] sm:$0xff] }
  0x30   :  { %726 = vmatpush.msrb.mxu2 %v201_v63  ;;  %681 = vmatpush.msra.mxu3 %v138_v1  ;;  %v209_v37 = vld [vmem:[#allocation5 + $0x3b8] sm:$0xff]  ;;  %v159_v38 = vld [vmem:[#allocation5 + $0x228] sm:$0xff]  ;;  %v176_v39 = vld [vmem:[#allocation5 + $0x2b0] sm:$0xff] }
  0x31   :  { %687 = vmatpush.msrb.mxu0 %v168_v2  ;;  %706 = vmatpush.msrb.mxu1 %v185_v3  ;;  %v191_v40 = vld [vmem:[#allocation5 + $0x328] sm:$0xff]  ;;  %v208_v41 = vld [vmem:[#allocation5 + $0x3b0] sm:$0xff]  ;;  %v158_v42 = vld [vmem:[#allocation5 + $0x220] sm:$0xff] }
  0x32   :  { %727 = vmatpush.msrb.mxu2 %v200_v4  ;;  %746 = vmatpush.msrb.mxu3 %v217_v5  ;;  %v175_v43 = vld [vmem:[#allocation5 + $0x2a8] sm:$0xff]  ;;  %v190_v44 = vld [vmem:[#allocation5 + $0x320] sm:$0xff]  ;;  %v157_v46 = vld [vmem:[#allocation5 + $0x218] sm:$0xff] }
  0x33   :  { %688 = vmatpush.msrb.mxu0 %v167_v6  ;;  %707 = vmatpush.msrb.mxu1 %v184_v7  ;;  %v207_v45 = vld [vmem:[#allocation5 + $0x3a8] sm:$0xff]  ;;  %v174_v47 = vld [vmem:[#allocation5 + $0x2a0] sm:$0xff]  ;;  %v189_v48 = vld [vmem:[#allocation5 + $0x318] sm:$0xff] }
  0x34   :  { %728 = vmatpush.msrb.mxu2 %v199_v8  ;;  %747 = vmatpush.msrb.mxu3 %v216_v9  ;;  %v206_v49 = vld [vmem:[#allocation5 + $0x3a0] sm:$0xff]  ;;  %v156_v50 = vld [vmem:[#allocation5 + $0x210] sm:$0xff]  ;;  %v173_v51 = vld [vmem:[#allocation5 + $0x298] sm:$0xff] }
  0x35   :  { %689 = vmatpush.msrb.mxu0 %v166_v10  ;;  %708 = vmatpush.msrb.mxu1 %v183_v11  ;;  %v188_v52 = vld [vmem:[#allocation5 + $0x310] sm:$0xff]  ;;  %v205_v53 = vld [vmem:[#allocation5 + $0x398] sm:$0xff]  ;;  %v155_v54 = vld [vmem:[#allocation5 + $0x208] sm:$0xff] }
  0x36   :  { %729 = vmatpush.msrb.mxu2 %v198_v12  ;;  %748 = vmatpush.msrb.mxu3 %v215_v13  ;;  %v172_v55 = vld [vmem:[#allocation5 + $0x290] sm:$0xff]  ;;  %v187_v56 = vld [vmem:[#allocation5 + $0x308] sm:$0xff]  ;;  %v154_v58 = vld [vmem:[#allocation5 + $0x200] sm:$0xff] }
  0x37   :  { %690 = vmatpush.msrb.mxu0 %v165_v14  ;;  %709 = vmatpush.msrb.mxu1 %v182_v15  ;;  %v204_v57 = vld [vmem:[#allocation5 + $0x390] sm:$0xff]  ;;  %v171_v59 = vld [vmem:[#allocation5 + $0x288] sm:$0xff]  ;;  %v186_v60 = vld [vmem:[#allocation5 + $0x300] sm:$0xff] }
  0x38   :  { %730 = vmatpush.msrb.mxu2 %v197_v16  ;;  %749 = vmatpush.msrb.mxu3 %v214_v17  ;;  %v203_v61 = vld [vmem:[#allocation5 + $0x388] sm:$0xff]  ;;  %v58_v62 = vld [vmem:[#allocation2] sm:$0xff]  ;;  %v60_v63 = vld [vmem:[#allocation2 + $0x10] sm:$0xff] }
  0x39   :  { %691 = vmatpush.msrb.mxu0 %v164_v18  ;;  %710 = vmatpush.msrb.mxu1 %v181_v19  ;;  %v233_v0 = vld [vmem:[#allocation5 + $0x478] sm:$0xff]  ;;  %v170_v2 = vld [vmem:[#allocation5 + $0x280] sm:$0xff]  ;;  %v59_v4 = vld [vmem:[#allocation2 + $0x8] sm:$0xff] }
  0x3a   :  { %731 = vmatpush.msrb.mxu2 %v196_v20  ;;  %750 = vmatpush.msrb.mxu3 %v213_v21  ;;  %v265_v1 = vld [vmem:[#allocation5 + $0x578] sm:$0xff]  ;;  %v202_v3 = vld [vmem:[#allocation5 + $0x380] sm:$0xff]  ;;  %v232_v6 = vld [vmem:[#allocation5 + $0x470] sm:$0xff] }
  0x3b   :  { %692 = vmatpush.msrb.mxu0 %v163_v22  ;;  %711 = vmatpush.msrb.mxu1 %v180_v23  ;;  %v61_v5 = vld [vmem:[#allocation2 + $0x18] sm:$0xff]  ;;  %v264_v8 = vld [vmem:[#allocation5 + $0x570] sm:$0xff]  ;;  %v231_v10 = vld [vmem:[#allocation5 + $0x468] sm:$0xff] }
  0x3c   :  { %732 = vmatpush.msrb.mxu2 %v195_v24  ;;  %751 = vmatpush.msrb.mxu3 %v212_v25  ;;  %v249_v7 = vld [vmem:[#allocation5 + $0x4f8] sm:$0xff]  ;;  %v248_v11 = vld [vmem:[#allocation5 + $0x4f0] sm:$0xff]  ;;  %v263_v12 = vld [vmem:[#allocation5 + $0x568] sm:$0xff] }
  0x3d   :  { %693 = vmatpush.msrb.mxu0 %v162_v26  ;;  %712 = vmatpush.msrb.mxu1 %v179_v27  ;;  %v281_v9 = vld [vmem:[#allocation5 + $0x5f8] sm:$0xff]  ;;  %v280_v13 = vld [vmem:[#allocation5 + $0x5f0] sm:$0xff]  ;;  %v230_v14 = vld [vmem:[#allocation5 + $0x460] sm:$0xff] }
  0x3e   :  { %733 = vmatpush.msrb.mxu2 %v194_v28  ;;  %752 = vmatpush.msrb.mxu3 %v211_v29  ;;  %v247_v15 = vld [vmem:[#allocation5 + $0x4e8] sm:$0xff]  ;;  %v262_v16 = vld [vmem:[#allocation5 + $0x560] sm:$0xff]  ;;  %v64_v18 = vld [vmem:[#allocation2 + $0x30] sm:$0xff] }
  0x3f   :  { %694 = vmatpush.msrb.mxu0 %v161_v30  ;;  %713 = vmatpush.msrb.mxu1 %v178_v31  ;;  %v279_v17 = vld [vmem:[#allocation5 + $0x5e8] sm:$0xff]  ;;  %v229_v19 = vld [vmem:[#allocation5 + $0x458] sm:$0xff]  ;;  %v246_v20 = vld [vmem:[#allocation5 + $0x4e0] sm:$0xff] }
  0x40   :  { %734 = vmatpush.msrb.mxu2 %v193_v32  ;;  %753 = vmatpush.msrb.mxu3 %v210_v33  ;;  %v261_v21 = vld [vmem:[#allocation5 + $0x558] sm:$0xff]  ;;  %v278_v22 = vld [vmem:[#allocation5 + $0x5e0] sm:$0xff]  ;;  %v228_v25 = vld [vmem:[#allocation5 + $0x450] sm:$0xff] }
  0x41   :  { %695 = vmatpush.msrb.mxu0 %v160_v34  ;;  %714 = vmatpush.msrb.mxu1 %v177_v35  ;;  %v62_v23 = vld [vmem:[#allocation2 + $0x20] sm:$0xff]  ;;  %v65_v24 = vld [vmem:[#allocation2 + $0x38] sm:$0xff]  ;;  %v260_v27 = vld [vmem:[#allocation5 + $0x550] sm:$0xff] }
  0x42   :  { %735 = vmatpush.msrb.mxu2 %v192_v36  ;;  %754 = vmatpush.msrb.mxu3 %v209_v37  ;;  %v245_v26 = vld [vmem:[#allocation5 + $0x4d8] sm:$0xff]  ;;  %v63_v29 = vld [vmem:[#allocation2 + $0x28] sm:$0xff]  ;;  %v244_v31 = vld [vmem:[#allocation5 + $0x4d0] sm:$0xff] }
  0x43   :  { %696 = vmatpush.msrb.mxu0 %v159_v38  ;;  %715 = vmatpush.msrb.mxu1 %v176_v39  ;;  %v277_v28 = vld [vmem:[#allocation5 + $0x5d8] sm:$0xff]  ;;  %v227_v30 = vld [vmem:[#allocation5 + $0x448] sm:$0xff]  ;;  %v276_v33 = vld [vmem:[#allocation5 + $0x5d0] sm:$0xff] }
  0x44   :  { %736 = vmatpush.msrb.mxu2 %v191_v40  ;;  %755 = vmatpush.msrb.mxu3 %v208_v41  ;;  %v259_v32 = vld [vmem:[#allocation5 + $0x548] sm:$0xff]  ;;  %v226_v34 = vld [vmem:[#allocation5 + $0x440] sm:$0xff]  ;;  %v225_v38 = vld [vmem:[#allocation5 + $0x438] sm:$0xff] }
  0x45   :  { %697 = vmatpush.msrb.mxu0 %v158_v42  ;;  %716 = vmatpush.msrb.mxu1 %v175_v43  ;;  %v243_v35 = vld [vmem:[#allocation5 + $0x4c8] sm:$0xff]  ;;  %v258_v36 = vld [vmem:[#allocation5 + $0x540] sm:$0xff]  ;;  %v257_v40 = vld [vmem:[#allocation5 + $0x538] sm:$0xff] }
  0x46   :  { %737 = vmatpush.msrb.mxu2 %v190_v44  ;;  %756 = vmatpush.msrb.mxu3 %v207_v45  ;;  %v275_v37 = vld [vmem:[#allocation5 + $0x5c8] sm:$0xff]  ;;  %v242_v39 = vld [vmem:[#allocation5 + $0x4c0] sm:$0xff]  ;;  %v224_v42 = vld [vmem:[#allocation5 + $0x430] sm:$0xff] }
  0x47   :  { %698 = vmatpush.msrb.mxu0 %v157_v46  ;;  %717 = vmatpush.msrb.mxu1 %v174_v47  ;;  %v274_v41 = vld [vmem:[#allocation5 + $0x5c0] sm:$0xff]  ;;  %v241_v43 = vld [vmem:[#allocation5 + $0x4b8] sm:$0xff]  ;;  %v256_v44 = vld [vmem:[#allocation5 + $0x530] sm:$0xff] }
  0x48   :  { %738 = vmatpush.msrb.mxu2 %v189_v48  ;;  %757 = vmatpush.msrb.mxu3 %v206_v49  ;;  %v273_v45 = vld [vmem:[#allocation5 + $0x5b8] sm:$0xff]  ;;  %v223_v46 = vld [vmem:[#allocation5 + $0x428] sm:$0xff]  ;;  %v240_v47 = vld [vmem:[#allocation5 + $0x4b0] sm:$0xff] }
  0x49   :  { %699 = vmatpush.msrb.mxu0 %v156_v50  ;;  %718 = vmatpush.msrb.mxu1 %v173_v51  ;;  %v255_v48 = vld [vmem:[#allocation5 + $0x528] sm:$0xff]  ;;  %v272_v49 = vld [vmem:[#allocation5 + $0x5b0] sm:$0xff]  ;;  %v222_v50 = vld [vmem:[#allocation5 + $0x420] sm:$0xff] }
  0x4a   :  { %739 = vmatpush.msrb.mxu2 %v188_v52  ;;  %758 = vmatpush.msrb.mxu3 %v205_v53  ;;  %v239_v51 = vld [vmem:[#allocation5 + $0x4a8] sm:$0xff]  ;;  %v254_v52 = vld [vmem:[#allocation5 + $0x520] sm:$0xff] }
  0x4b   :  { %700 = vmatpush.msrb.mxu0 %v155_v54  ;;  %719 = vmatpush.msrb.mxu1 %v172_v55  ;;  %v271_v53 = vld [vmem:[#allocation5 + $0x5a8] sm:$0xff]  ;;  %v221_v54 = vld [vmem:[#allocation5 + $0x418] sm:$0xff]  ;;  %v238_v55 = vld [vmem:[#allocation5 + $0x4a0] sm:$0xff] }
  0x4c   :  { %740 = vmatpush.msrb.mxu2 %v187_v56  ;;  %759 = vmatpush.msrb.mxu3 %v204_v57  ;;  %v253_v56 = vld [vmem:[#allocation5 + $0x518] sm:$0xff]  ;;  %v270_v57 = vld [vmem:[#allocation5 + $0x5a0] sm:$0xff] }
  0x4d   :  { %701 = vmatpush.msrb.mxu0 %v154_v58  ;;  %720 = vmatpush.msrb.mxu1 %v171_v59  ;;  %v220_v58 = vld [vmem:[#allocation5 + $0x410] sm:$0xff]  ;;  %v237_v59 = vld [vmem:[#allocation5 + $0x498] sm:$0xff] }
  0x4e   :  { %741 = vmatpush.msrb.mxu2 %v186_v60  ;;  %760 = vmatpush.msrb.mxu3 %v203_v61  ;;  %v252_v60 = vld [vmem:[#allocation5 + $0x510] sm:$0xff]  ;;  %v269_v61 = vld [vmem:[#allocation5 + $0x598] sm:$0xff] }
  0x4f   :  { %622 = vmatmul.f32.vlgmr.msra.gmra.mxu0 %v58_v62  ;;  %662 = vmatmul.f32.vlgmr.msra.gmra.mxu2 %v60_v63  ;;  %v219_v62 = vld [vmem:[#allocation5 + $0x408] sm:$0xff]  ;;  %v236_v63 = vld [vmem:[#allocation5 + $0x490] sm:$0xff] }
  0x50   :  { %766 = vmatpush.msra.mxu0 %v233_v0  ;;  %806 = vmatpush.msra.mxu2 %v265_v1  ;;  %v251_v0 = vld [vmem:[#allocation5 + $0x508] sm:$0xff]  ;;  %v268_v1 = vld [vmem:[#allocation5 + $0x590] sm:$0xff] }
  0x51   :  { %721 = vmatpush.msrb.mxu1 %v170_v2  ;;  %761 = vmatpush.msrb.mxu3 %v202_v3  ;;  %v218_v2 = vld [vmem:[#allocation5 + $0x400] sm:$0xff]  ;;  %v235_v3 = vld [vmem:[#allocation5 + $0x488] sm:$0xff] }
  0x52   :  { %642 = vmatmul.f32.vlgmr.msra.gmra.mxu1 %v59_v4  ;;  %682 = vmatmul.f32.vlgmr.msra.gmra.mxu3 %v61_v5  ;;  %v250_v4 = vld [vmem:[#allocation5 + $0x500] sm:$0xff]  ;;  %v267_v5 = vld [vmem:[#allocation5 + $0x588] sm:$0xff] }
  0x53   :  { %767 = vmatpush.msra.mxu0 %v232_v6  ;;  %786 = vmatpush.msra.mxu1 %v249_v7  ;;  %v66_v6 = vld [vmem:[#allocation2 + $0x40] sm:$0xff]  ;;  %v68_v7 = vld [vmem:[#allocation2 + $0x50] sm:$0xff] }
  0x54   :  { %807 = vmatpush.msra.mxu2 %v264_v8  ;;  %826 = vmatpush.msra.mxu3 %v281_v9  ;;  %v297_v8 = vld [vmem:[#allocation5 + $0x678] sm:$0xff] }
  0x55   :  { %768 = vmatpush.msra.mxu0 %v231_v10  ;;  %787 = vmatpush.msra.mxu1 %v248_v11  ;;  %v329_v9 = vld [vmem:[#allocation5 + $0x778] sm:$0xff]  ;;  %v234_v10 = vld [vmem:[#allocation5 + $0x480] sm:$0xff] }
  0x56   :  { %808 = vmatpush.msra.mxu2 %v263_v12  ;;  %827 = vmatpush.msra.mxu3 %v280_v13  ;;  %v266_v11 = vld [vmem:[#allocation5 + $0x580] sm:$0xff]  ;;  %v67_v12 = vld [vmem:[#allocation2 + $0x48] sm:$0xff]  ;;  %v69_v13 = vld [vmem:[#allocation2 + $0x58] sm:$0xff] }
  0x57   :  { %769 = vmatpush.msra.mxu0 %v230_v14  ;;  %788 = vmatpush.msra.mxu1 %v247_v15  ;;  %v296_v14 = vld [vmem:[#allocation5 + $0x670] sm:$0xff]  ;;  %v313_v15 = vld [vmem:[#allocation5 + $0x6f8] sm:$0xff] }
  0x58   :  { %809 = vmatpush.msra.mxu2 %v262_v16  ;;  %828 = vmatpush.msra.mxu3 %v279_v17  ;;  %v328_v16 = vld [vmem:[#allocation5 + $0x770] sm:$0xff]  ;;  %v345_v17 = vld [vmem:[#allocation5 + $0x7f8] sm:$0xff] }
  0x59   :  { %742 = vmatmul.f32.vlgmr.msrb.gmra.mxu2 %v64_v18  ;;  %770 = vmatpush.msra.mxu0 %v229_v19  ;;  %v295_v18 = vld [vmem:[#allocation5 + $0x668] sm:$0xff]  ;;  %v312_v19 = vld [vmem:[#allocation5 + $0x6f0] sm:$0xff] }
  0x5a   :  { %789 = vmatpush.msra.mxu1 %v246_v20  ;;  %810 = vmatpush.msra.mxu2 %v261_v21  ;;  %v327_v20 = vld [vmem:[#allocation5 + $0x768] sm:$0xff]  ;;  %v344_v21 = vld [vmem:[#allocation5 + $0x7f0] sm:$0xff] }
  0x5b   :  { %829 = vmatpush.msra.mxu3 %v278_v22  ;;  %702 = vmatmul.f32.vlgmr.msrb.gmra.mxu0 %v62_v23  ;;  %v294_v22 = vld [vmem:[#allocation5 + $0x660] sm:$0xff]  ;;  %v311_v23 = vld [vmem:[#allocation5 + $0x6e8] sm:$0xff] }
  0x5c   :  { %762 = vmatmul.f32.vlgmr.msrb.gmra.mxu3 %v65_v24  ;;  %771 = vmatpush.msra.mxu0 %v228_v25  ;;  %v326_v24 = vld [vmem:[#allocation5 + $0x760] sm:$0xff]  ;;  %v343_v25 = vld [vmem:[#allocation5 + $0x7e8] sm:$0xff] }
  0x5d   :  { %790 = vmatpush.msra.mxu1 %v245_v26  ;;  %811 = vmatpush.msra.mxu2 %v260_v27  ;;  %v293_v26 = vld [vmem:[#allocation5 + $0x658] sm:$0xff]  ;;  %v310_v27 = vld [vmem:[#allocation5 + $0x6e0] sm:$0xff] }
  0x5e   :  { %830 = vmatpush.msra.mxu3 %v277_v28  ;;  %722 = vmatmul.f32.vlgmr.msrb.gmra.mxu1 %v63_v29  ;;  %v325_v28 = vld [vmem:[#allocation5 + $0x758] sm:$0xff]  ;;  %v342_v29 = vld [vmem:[#allocation5 + $0x7e0] sm:$0xff] }
  0x5f   :  { %772 = vmatpush.msra.mxu0 %v227_v30  ;;  %791 = vmatpush.msra.mxu1 %v244_v31  ;;  %v292_v30 = vld [vmem:[#allocation5 + $0x650] sm:$0xff]  ;;  %v309_v31 = vld [vmem:[#allocation5 + $0x6d8] sm:$0xff] }
  0x60   :  { %812 = vmatpush.msra.mxu2 %v259_v32  ;;  %831 = vmatpush.msra.mxu3 %v276_v33  ;;  %v324_v32 = vld [vmem:[#allocation5 + $0x750] sm:$0xff]  ;;  %v341_v33 = vld [vmem:[#allocation5 + $0x7d8] sm:$0xff] }
  0x61   :  { %773 = vmatpush.msra.mxu0 %v226_v34  ;;  %792 = vmatpush.msra.mxu1 %v243_v35  ;;  %v291_v34 = vld [vmem:[#allocation5 + $0x648] sm:$0xff]  ;;  %v308_v35 = vld [vmem:[#allocation5 + $0x6d0] sm:$0xff] }
  0x62   :  { %813 = vmatpush.msra.mxu2 %v258_v36  ;;  %832 = vmatpush.msra.mxu3 %v275_v37  ;;  %v323_v36 = vld [vmem:[#allocation5 + $0x748] sm:$0xff]  ;;  %v340_v37 = vld [vmem:[#allocation5 + $0x7d0] sm:$0xff] }
  0x63   :  { %774 = vmatpush.msra.mxu0 %v225_v38  ;;  %793 = vmatpush.msra.mxu1 %v242_v39  ;;  %v290_v38 = vld [vmem:[#allocation5 + $0x640] sm:$0xff]  ;;  %v307_v39 = vld [vmem:[#allocation5 + $0x6c8] sm:$0xff] }
  0x64   :  { %814 = vmatpush.msra.mxu2 %v257_v40  ;;  %833 = vmatpush.msra.mxu3 %v274_v41  ;;  %v322_v40 = vld [vmem:[#allocation5 + $0x740] sm:$0xff]  ;;  %v339_v41 = vld [vmem:[#allocation5 + $0x7c8] sm:$0xff] }
  0x65   :  { %775 = vmatpush.msra.mxu0 %v224_v42  ;;  %794 = vmatpush.msra.mxu1 %v241_v43  ;;  %v289_v42 = vld [vmem:[#allocation5 + $0x638] sm:$0xff]  ;;  %v306_v43 = vld [vmem:[#allocation5 + $0x6c0] sm:$0xff] }
  0x66   :  { %815 = vmatpush.msra.mxu2 %v256_v44  ;;  %834 = vmatpush.msra.mxu3 %v273_v45  ;;  %v321_v44 = vld [vmem:[#allocation5 + $0x738] sm:$0xff]  ;;  %v338_v45 = vld [vmem:[#allocation5 + $0x7c0] sm:$0xff] }
  0x67   :  { %776 = vmatpush.msra.mxu0 %v223_v46  ;;  %795 = vmatpush.msra.mxu1 %v240_v47  ;;  %v288_v46 = vld [vmem:[#allocation5 + $0x630] sm:$0xff]  ;;  %v305_v47 = vld [vmem:[#allocation5 + $0x6b8] sm:$0xff] }
  0x68   :  { %816 = vmatpush.msra.mxu2 %v255_v48  ;;  %835 = vmatpush.msra.mxu3 %v272_v49  ;;  %v320_v48 = vld [vmem:[#allocation5 + $0x730] sm:$0xff]  ;;  %v337_v49 = vld [vmem:[#allocation5 + $0x7b8] sm:$0xff] }
  0x69   :  { %777 = vmatpush.msra.mxu0 %v222_v50  ;;  %796 = vmatpush.msra.mxu1 %v239_v51  ;;  %v287_v50 = vld [vmem:[#allocation5 + $0x628] sm:$0xff]  ;;  %v304_v51 = vld [vmem:[#allocation5 + $0x6b0] sm:$0xff] }
  0x6a   :  { %817 = vmatpush.msra.mxu2 %v254_v52  ;;  %836 = vmatpush.msra.mxu3 %v271_v53  ;;  %v319_v52 = vld [vmem:[#allocation5 + $0x728] sm:$0xff]  ;;  %v336_v53 = vld [vmem:[#allocation5 + $0x7b0] sm:$0xff] }
  0x6b   :  { %778 = vmatpush.msra.mxu0 %v221_v54  ;;  %797 = vmatpush.msra.mxu1 %v238_v55  ;;  %v286_v54 = vld [vmem:[#allocation5 + $0x620] sm:$0xff]  ;;  %v303_v55 = vld [vmem:[#allocation5 + $0x6a8] sm:$0xff] }
  0x6c   :  { %818 = vmatpush.msra.mxu2 %v253_v56  ;;  %837 = vmatpush.msra.mxu3 %v270_v57  ;;  %v318_v56 = vld [vmem:[#allocation5 + $0x720] sm:$0xff]  ;;  %v335_v57 = vld [vmem:[#allocation5 + $0x7a8] sm:$0xff] }
  0x6d   :  { %779 = vmatpush.msra.mxu0 %v220_v58  ;;  %798 = vmatpush.msra.mxu1 %v237_v59  ;;  %v285_v58 = vld [vmem:[#allocation5 + $0x618] sm:$0xff]  ;;  %v302_v59 = vld [vmem:[#allocation5 + $0x6a0] sm:$0xff] }
  0x6e   :  { %819 = vmatpush.msra.mxu2 %v252_v60  ;;  %838 = vmatpush.msra.mxu3 %v269_v61  ;;  %v317_v60 = vld [vmem:[#allocation5 + $0x718] sm:$0xff]  ;;  %v334_v61 = vld [vmem:[#allocation5 + $0x7a0] sm:$0xff] }
  0x6f   :  { %780 = vmatpush.msra.mxu0 %v219_v62  ;;  %799 = vmatpush.msra.mxu1 %v236_v63  ;;  %v284_v62 = vld [vmem:[#allocation5 + $0x610] sm:$0xff]  ;;  %v301_v63 = vld [vmem:[#allocation5 + $0x698] sm:$0xff] }
  0x70   :  { %820 = vmatpush.msra.mxu2 %v251_v0  ;;  %839 = vmatpush.msra.mxu3 %v268_v1  ;;  %v316_v0 = vld [vmem:[#allocation5 + $0x710] sm:$0xff]  ;;  %v333_v1 = vld [vmem:[#allocation5 + $0x798] sm:$0xff] }
  0x71   :  { %781 = vmatpush.msra.mxu0 %v218_v2  ;;  %800 = vmatpush.msra.mxu1 %v235_v3  ;;  %v283_v2 = vld [vmem:[#allocation5 + $0x608] sm:$0xff]  ;;  %v300_v3 = vld [vmem:[#allocation5 + $0x690] sm:$0xff] }
  0x72   :  { %821 = vmatpush.msra.mxu2 %v250_v4  ;;  %840 = vmatpush.msra.mxu3 %v267_v5  ;;  %v315_v4 = vld [vmem:[#allocation5 + $0x708] sm:$0xff]  ;;  %v332_v5 = vld [vmem:[#allocation5 + $0x790] sm:$0xff] }
  0x73   :  { %782 = vmatmul.f32.vlgmr.msra.gmra.mxu0 %v66_v6  ;;  %822 = vmatmul.f32.vlgmr.msra.gmra.mxu2 %v68_v7  ;;  %v282_v6 = vld [vmem:[#allocation5 + $0x600] sm:$0xff]  ;;  %v299_v7 = vld [vmem:[#allocation5 + $0x688] sm:$0xff] }
  0x74   :  { %846 = vmatpush.msrb.mxu0 %v297_v8  ;;  %886 = vmatpush.msrb.mxu2 %v329_v9  ;;  %v314_v8 = vld [vmem:[#allocation5 + $0x700] sm:$0xff]  ;;  %v331_v9 = vld [vmem:[#allocation5 + $0x788] sm:$0xff] }
  0x75   :  { %801 = vmatpush.msra.mxu1 %v234_v10  ;;  %841 = vmatpush.msra.mxu3 %v266_v11  ;;  %v70_v10 = vld [vmem:[#allocation2 + $0x60] sm:$0xff]  ;;  %v72_v11 = vld [vmem:[#allocation2 + $0x70] sm:$0xff] }
  0x76   :  { %802 = vmatmul.f32.vlgmr.msra.gmra.mxu1 %v67_v12  ;;  %842 = vmatmul.f32.vlgmr.msra.gmra.mxu3 %v69_v13  ;;  %v361_v12 = vld [vmem:[#allocation5 + $0x878] sm:$0xff] }
  0x77   :  { %847 = vmatpush.msrb.mxu0 %v296_v14  ;;  %866 = vmatpush.msrb.mxu1 %v313_v15  ;;  %v393_v13 = vld [vmem:[#allocation5 + $0x978] sm:$0xff]  ;;  %v298_v14 = vld [vmem:[#allocation5 + $0x680] sm:$0xff] }
  0x78   :  { %887 = vmatpush.msrb.mxu2 %v328_v16  ;;  %906 = vmatpush.msrb.mxu3 %v345_v17  ;;  %v330_v15 = vld [vmem:[#allocation5 + $0x780] sm:$0xff]  ;;  %v71_v16 = vld [vmem:[#allocation2 + $0x68] sm:$0xff]  ;;  %v73_v17 = vld [vmem:[#allocation2 + $0x78] sm:$0xff] }
  0x79   :  { %848 = vmatpush.msrb.mxu0 %v295_v18  ;;  %867 = vmatpush.msrb.mxu1 %v312_v19  ;;  %v360_v18 = vld [vmem:[#allocation5 + $0x870] sm:$0xff]  ;;  %v377_v19 = vld [vmem:[#allocation5 + $0x8f8] sm:$0xff] }
  0x7a   :  { %888 = vmatpush.msrb.mxu2 %v327_v20  ;;  %907 = vmatpush.msrb.mxu3 %v344_v21  ;;  %v392_v20 = vld [vmem:[#allocation5 + $0x970] sm:$0xff]  ;;  %v409_v21 = vld [vmem:[#allocation5 + $0x9f8] sm:$0xff] }
  0x7b   :  { %849 = vmatpush.msrb.mxu0 %v294_v22  ;;  %868 = vmatpush.msrb.mxu1 %v311_v23  ;;  %v359_v22 = vld [vmem:[#allocation5 + $0x868] sm:$0xff]  ;;  %v376_v23 = vld [vmem:[#allocation5 + $0x8f0] sm:$0xff] }
  0x7c   :  { %889 = vmatpush.msrb.mxu2 %v326_v24  ;;  %908 = vmatpush.msrb.mxu3 %v343_v25  ;;  %v391_v24 = vld [vmem:[#allocation5 + $0x968] sm:$0xff]  ;;  %v408_v25 = vld [vmem:[#allocation5 + $0x9f0] sm:$0xff] }
  0x7d   :  { %850 = vmatpush.msrb.mxu0 %v293_v26  ;;  %869 = vmatpush.msrb.mxu1 %v310_v27  ;;  %v358_v26 = vld [vmem:[#allocation5 + $0x860] sm:$0xff]  ;;  %v375_v27 = vld [vmem:[#allocation5 + $0x8e8] sm:$0xff] }
  0x7e   :  { %890 = vmatpush.msrb.mxu2 %v325_v28  ;;  %909 = vmatpush.msrb.mxu3 %v342_v29  ;;  %v390_v28 = vld [vmem:[#allocation5 + $0x960] sm:$0xff]  ;;  %v407_v29 = vld [vmem:[#allocation5 + $0x9e8] sm:$0xff] }
  0x7f   :  { %851 = vmatpush.msrb.mxu0 %v292_v30  ;;  %870 = vmatpush.msrb.mxu1 %v309_v31  ;;  %v357_v30 = vld [vmem:[#allocation5 + $0x858] sm:$0xff]  ;;  %v374_v31 = vld [vmem:[#allocation5 + $0x8e0] sm:$0xff] }
  0x80   :  { %891 = vmatpush.msrb.mxu2 %v324_v32  ;;  %910 = vmatpush.msrb.mxu3 %v341_v33  ;;  %v389_v32 = vld [vmem:[#allocation5 + $0x958] sm:$0xff]  ;;  %v406_v33 = vld [vmem:[#allocation5 + $0x9e0] sm:$0xff] }
  0x81   :  { %852 = vmatpush.msrb.mxu0 %v291_v34  ;;  %871 = vmatpush.msrb.mxu1 %v308_v35  ;;  %v356_v34 = vld [vmem:[#allocation5 + $0x850] sm:$0xff]  ;;  %v373_v35 = vld [vmem:[#allocation5 + $0x8d8] sm:$0xff] }
  0x82   :  { %892 = vmatpush.msrb.mxu2 %v323_v36  ;;  %911 = vmatpush.msrb.mxu3 %v340_v37  ;;  %v388_v36 = vld [vmem:[#allocation5 + $0x950] sm:$0xff]  ;;  %v405_v37 = vld [vmem:[#allocation5 + $0x9d8] sm:$0xff] }
  0x83   :  { %853 = vmatpush.msrb.mxu0 %v290_v38  ;;  %872 = vmatpush.msrb.mxu1 %v307_v39  ;;  %v355_v38 = vld [vmem:[#allocation5 + $0x848] sm:$0xff]  ;;  %v372_v39 = vld [vmem:[#allocation5 + $0x8d0] sm:$0xff] }
  0x84   :  { %893 = vmatpush.msrb.mxu2 %v322_v40  ;;  %912 = vmatpush.msrb.mxu3 %v339_v41  ;;  %v387_v40 = vld [vmem:[#allocation5 + $0x948] sm:$0xff]  ;;  %v404_v41 = vld [vmem:[#allocation5 + $0x9d0] sm:$0xff] }
  0x85   :  { %854 = vmatpush.msrb.mxu0 %v289_v42  ;;  %873 = vmatpush.msrb.mxu1 %v306_v43  ;;  %v354_v42 = vld [vmem:[#allocation5 + $0x840] sm:$0xff]  ;;  %v371_v43 = vld [vmem:[#allocation5 + $0x8c8] sm:$0xff] }
  0x86   :  { %894 = vmatpush.msrb.mxu2 %v321_v44  ;;  %913 = vmatpush.msrb.mxu3 %v338_v45  ;;  %v386_v44 = vld [vmem:[#allocation5 + $0x940] sm:$0xff]  ;;  %v403_v45 = vld [vmem:[#allocation5 + $0x9c8] sm:$0xff] }
  0x87   :  { %855 = vmatpush.msrb.mxu0 %v288_v46  ;;  %874 = vmatpush.msrb.mxu1 %v305_v47  ;;  %v353_v46 = vld [vmem:[#allocation5 + $0x838] sm:$0xff]  ;;  %v370_v47 = vld [vmem:[#allocation5 + $0x8c0] sm:$0xff] }
  0x88   :  { %895 = vmatpush.msrb.mxu2 %v320_v48  ;;  %914 = vmatpush.msrb.mxu3 %v337_v49  ;;  %v385_v48 = vld [vmem:[#allocation5 + $0x938] sm:$0xff]  ;;  %v402_v49 = vld [vmem:[#allocation5 + $0x9c0] sm:$0xff] }
  0x89   :  { %856 = vmatpush.msrb.mxu0 %v287_v50  ;;  %875 = vmatpush.msrb.mxu1 %v304_v51  ;;  %v352_v50 = vld [vmem:[#allocation5 + $0x830] sm:$0xff]  ;;  %v369_v51 = vld [vmem:[#allocation5 + $0x8b8] sm:$0xff] }
  0x8a   :  { %896 = vmatpush.msrb.mxu2 %v319_v52  ;;  %915 = vmatpush.msrb.mxu3 %v336_v53  ;;  %v384_v52 = vld [vmem:[#allocation5 + $0x930] sm:$0xff]  ;;  %v401_v53 = vld [vmem:[#allocation5 + $0x9b8] sm:$0xff] }
  0x8b   :  { %857 = vmatpush.msrb.mxu0 %v286_v54  ;;  %876 = vmatpush.msrb.mxu1 %v303_v55  ;;  %v351_v54 = vld [vmem:[#allocation5 + $0x828] sm:$0xff]  ;;  %v368_v55 = vld [vmem:[#allocation5 + $0x8b0] sm:$0xff] }
  0x8c   :  { %897 = vmatpush.msrb.mxu2 %v318_v56  ;;  %916 = vmatpush.msrb.mxu3 %v335_v57  ;;  %v383_v56 = vld [vmem:[#allocation5 + $0x928] sm:$0xff]  ;;  %v400_v57 = vld [vmem:[#allocation5 + $0x9b0] sm:$0xff] }
  0x8d   :  { %858 = vmatpush.msrb.mxu0 %v285_v58  ;;  %877 = vmatpush.msrb.mxu1 %v302_v59  ;;  %v350_v58 = vld [vmem:[#allocation5 + $0x820] sm:$0xff]  ;;  %v367_v59 = vld [vmem:[#allocation5 + $0x8a8] sm:$0xff] }
  0x8e   :  { %898 = vmatpush.msrb.mxu2 %v317_v60  ;;  %917 = vmatpush.msrb.mxu3 %v334_v61  ;;  %v382_v60 = vld [vmem:[#allocation5 + $0x920] sm:$0xff]  ;;  %v399_v61 = vld [vmem:[#allocation5 + $0x9a8] sm:$0xff] }
  0x8f   :  { %859 = vmatpush.msrb.mxu0 %v284_v62  ;;  %878 = vmatpush.msrb.mxu1 %v301_v63  ;;  %v349_v62 = vld [vmem:[#allocation5 + $0x818] sm:$0xff]  ;;  %v366_v63 = vld [vmem:[#allocation5 + $0x8a0] sm:$0xff] }
  0x90   :  { %899 = vmatpush.msrb.mxu2 %v316_v0  ;;  %918 = vmatpush.msrb.mxu3 %v333_v1  ;;  %v381_v0 = vld [vmem:[#allocation5 + $0x918] sm:$0xff]  ;;  %v398_v1 = vld [vmem:[#allocation5 + $0x9a0] sm:$0xff] }
  0x91   :  { %860 = vmatpush.msrb.mxu0 %v283_v2  ;;  %879 = vmatpush.msrb.mxu1 %v300_v3  ;;  %v348_v2 = vld [vmem:[#allocation5 + $0x810] sm:$0xff]  ;;  %v365_v3 = vld [vmem:[#allocation5 + $0x898] sm:$0xff] }
  0x92   :  { %900 = vmatpush.msrb.mxu2 %v315_v4  ;;  %919 = vmatpush.msrb.mxu3 %v332_v5  ;;  %v380_v4 = vld [vmem:[#allocation5 + $0x910] sm:$0xff]  ;;  %v397_v5 = vld [vmem:[#allocation5 + $0x998] sm:$0xff] }
  0x93   :  { %861 = vmatpush.msrb.mxu0 %v282_v6  ;;  %880 = vmatpush.msrb.mxu1 %v299_v7  ;;  %v347_v6 = vld [vmem:[#allocation5 + $0x808] sm:$0xff]  ;;  %v364_v7 = vld [vmem:[#allocation5 + $0x890] sm:$0xff] }
  0x94   :  { %901 = vmatpush.msrb.mxu2 %v314_v8  ;;  %920 = vmatpush.msrb.mxu3 %v331_v9  ;;  %v379_v8 = vld [vmem:[#allocation5 + $0x908] sm:$0xff]  ;;  %v396_v9 = vld [vmem:[#allocation5 + $0x990] sm:$0xff] }
  0x95   :  { %862 = vmatmul.f32.vlgmr.msrb.gmra.mxu0 %v70_v10  ;;  %902 = vmatmul.f32.vlgmr.msrb.gmra.mxu2 %v72_v11  ;;  %v346_v10 = vld [vmem:[#allocation5 + $0x800] sm:$0xff]  ;;  %v363_v11 = vld [vmem:[#allocation5 + $0x888] sm:$0xff] }
  0x96   :  { %926 = vmatpush.msra.mxu0 %v361_v12  ;;  %966 = vmatpush.msra.mxu2 %v393_v13  ;;  %v378_v12 = vld [vmem:[#allocation5 + $0x900] sm:$0xff]  ;;  %v395_v13 = vld [vmem:[#allocation5 + $0x988] sm:$0xff] }
  0x97   :  { %881 = vmatpush.msrb.mxu1 %v298_v14  ;;  %921 = vmatpush.msrb.mxu3 %v330_v15  ;;  %v74_v14 = vld [vmem:[#allocation2 + $0x80] sm:$0xff]  ;;  %v76_v15 = vld [vmem:[#allocation2 + $0x90] sm:$0xff] }
  0x98   :  { %882 = vmatmul.f32.vlgmr.msrb.gmra.mxu1 %v71_v16  ;;  %922 = vmatmul.f32.vlgmr.msrb.gmra.mxu3 %v73_v17  ;;  %v425_v16 = vld [vmem:[#allocation5 + $0xa78] sm:$0xff] }
  0x99   :  { %927 = vmatpush.msra.mxu0 %v360_v18  ;;  %946 = vmatpush.msra.mxu1 %v377_v19  ;;  %v457_v17 = vld [vmem:[#allocation5 + $0xb78] sm:$0xff]  ;;  %v362_v18 = vld [vmem:[#allocation5 + $0x880] sm:$0xff] }
  0x9a   :  { %967 = vmatpush.msra.mxu2 %v392_v20  ;;  %986 = vmatpush.msra.mxu3 %v409_v21  ;;  %v394_v19 = vld [vmem:[#allocation5 + $0x980] sm:$0xff]  ;;  %v75_v20 = vld [vmem:[#allocation2 + $0x88] sm:$0xff]  ;;  %v77_v21 = vld [vmem:[#allocation2 + $0x98] sm:$0xff] }
  0x9b   :  { %928 = vmatpush.msra.mxu0 %v359_v22  ;;  %947 = vmatpush.msra.mxu1 %v376_v23  ;;  %v424_v22 = vld [vmem:[#allocation5 + $0xa70] sm:$0xff]  ;;  %v441_v23 = vld [vmem:[#allocation5 + $0xaf8] sm:$0xff] }
  0x9c   :  { %968 = vmatpush.msra.mxu2 %v391_v24  ;;  %987 = vmatpush.msra.mxu3 %v408_v25  ;;  %v456_v24 = vld [vmem:[#allocation5 + $0xb70] sm:$0xff]  ;;  %v473_v25 = vld [vmem:[#allocation5 + $0xbf8] sm:$0xff] }
  0x9d   :  { %929 = vmatpush.msra.mxu0 %v358_v26  ;;  %948 = vmatpush.msra.mxu1 %v375_v27  ;;  %v423_v26 = vld [vmem:[#allocation5 + $0xa68] sm:$0xff]  ;;  %v440_v27 = vld [vmem:[#allocation5 + $0xaf0] sm:$0xff] }
  0x9e   :  { %969 = vmatpush.msra.mxu2 %v390_v28  ;;  %988 = vmatpush.msra.mxu3 %v407_v29  ;;  %v455_v28 = vld [vmem:[#allocation5 + $0xb68] sm:$0xff]  ;;  %v472_v29 = vld [vmem:[#allocation5 + $0xbf0] sm:$0xff] }
  0x9f   :  { %930 = vmatpush.msra.mxu0 %v357_v30  ;;  %949 = vmatpush.msra.mxu1 %v374_v31  ;;  %v422_v30 = vld [vmem:[#allocation5 + $0xa60] sm:$0xff]  ;;  %v439_v31 = vld [vmem:[#allocation5 + $0xae8] sm:$0xff] }
  0xa0   :  { %970 = vmatpush.msra.mxu2 %v389_v32  ;;  %989 = vmatpush.msra.mxu3 %v406_v33  ;;  %v454_v32 = vld [vmem:[#allocation5 + $0xb60] sm:$0xff]  ;;  %v471_v33 = vld [vmem:[#allocation5 + $0xbe8] sm:$0xff] }
  0xa1   :  { %931 = vmatpush.msra.mxu0 %v356_v34  ;;  %950 = vmatpush.msra.mxu1 %v373_v35  ;;  %v421_v34 = vld [vmem:[#allocation5 + $0xa58] sm:$0xff]  ;;  %v438_v35 = vld [vmem:[#allocation5 + $0xae0] sm:$0xff] }
  0xa2   :  { %971 = vmatpush.msra.mxu2 %v388_v36  ;;  %990 = vmatpush.msra.mxu3 %v405_v37  ;;  %v453_v36 = vld [vmem:[#allocation5 + $0xb58] sm:$0xff]  ;;  %v470_v37 = vld [vmem:[#allocation5 + $0xbe0] sm:$0xff] }
  0xa3   :  { %932 = vmatpush.msra.mxu0 %v355_v38  ;;  %951 = vmatpush.msra.mxu1 %v372_v39  ;;  %v420_v38 = vld [vmem:[#allocation5 + $0xa50] sm:$0xff]  ;;  %v437_v39 = vld [vmem:[#allocation5 + $0xad8] sm:$0xff] }
  0xa4   :  { %972 = vmatpush.msra.mxu2 %v387_v40  ;;  %991 = vmatpush.msra.mxu3 %v404_v41  ;;  %v452_v40 = vld [vmem:[#allocation5 + $0xb50] sm:$0xff]  ;;  %v469_v41 = vld [vmem:[#allocation5 + $0xbd8] sm:$0xff] }
  0xa5   :  { %933 = vmatpush.msra.mxu0 %v354_v42  ;;  %952 = vmatpush.msra.mxu1 %v371_v43  ;;  %v419_v42 = vld [vmem:[#allocation5 + $0xa48] sm:$0xff]  ;;  %v436_v43 = vld [vmem:[#allocation5 + $0xad0] sm:$0xff] }
  0xa6   :  { %973 = vmatpush.msra.mxu2 %v386_v44  ;;  %992 = vmatpush.msra.mxu3 %v403_v45  ;;  %v451_v44 = vld [vmem:[#allocation5 + $0xb48] sm:$0xff]  ;;  %v468_v45 = vld [vmem:[#allocation5 + $0xbd0] sm:$0xff] }
  0xa7   :  { %934 = vmatpush.msra.mxu0 %v353_v46  ;;  %953 = vmatpush.msra.mxu1 %v370_v47  ;;  %v418_v46 = vld [vmem:[#allocation5 + $0xa40] sm:$0xff]  ;;  %v435_v47 = vld [vmem:[#allocation5 + $0xac8] sm:$0xff] }
  0xa8   :  { %974 = vmatpush.msra.mxu2 %v385_v48  ;;  %993 = vmatpush.msra.mxu3 %v402_v49  ;;  %v450_v48 = vld [vmem:[#allocation5 + $0xb40] sm:$0xff]  ;;  %v467_v49 = vld [vmem:[#allocation5 + $0xbc8] sm:$0xff] }
  0xa9   :  { %935 = vmatpush.msra.mxu0 %v352_v50  ;;  %954 = vmatpush.msra.mxu1 %v369_v51  ;;  %v417_v50 = vld [vmem:[#allocation5 + $0xa38] sm:$0xff]  ;;  %v434_v51 = vld [vmem:[#allocation5 + $0xac0] sm:$0xff] }
  0xaa   :  { %975 = vmatpush.msra.mxu2 %v384_v52  ;;  %994 = vmatpush.msra.mxu3 %v401_v53  ;;  %v449_v52 = vld [vmem:[#allocation5 + $0xb38] sm:$0xff]  ;;  %v466_v53 = vld [vmem:[#allocation5 + $0xbc0] sm:$0xff] }
  0xab   :  { %936 = vmatpush.msra.mxu0 %v351_v54  ;;  %955 = vmatpush.msra.mxu1 %v368_v55  ;;  %v416_v54 = vld [vmem:[#allocation5 + $0xa30] sm:$0xff]  ;;  %v433_v55 = vld [vmem:[#allocation5 + $0xab8] sm:$0xff] }
  0xac   :  { %976 = vmatpush.msra.mxu2 %v383_v56  ;;  %995 = vmatpush.msra.mxu3 %v400_v57  ;;  %v448_v56 = vld [vmem:[#allocation5 + $0xb30] sm:$0xff]  ;;  %v465_v57 = vld [vmem:[#allocation5 + $0xbb8] sm:$0xff] }
  0xad   :  { %937 = vmatpush.msra.mxu0 %v350_v58  ;;  %956 = vmatpush.msra.mxu1 %v367_v59  ;;  %v415_v58 = vld [vmem:[#allocation5 + $0xa28] sm:$0xff]  ;;  %v432_v59 = vld [vmem:[#allocation5 + $0xab0] sm:$0xff] }
  0xae   :  { %977 = vmatpush.msra.mxu2 %v382_v60  ;;  %996 = vmatpush.msra.mxu3 %v399_v61  ;;  %v447_v60 = vld [vmem:[#allocation5 + $0xb28] sm:$0xff]  ;;  %v464_v61 = vld [vmem:[#allocation5 + $0xbb0] sm:$0xff] }
  0xaf   :  { %938 = vmatpush.msra.mxu0 %v349_v62  ;;  %957 = vmatpush.msra.mxu1 %v366_v63  ;;  %v414_v62 = vld [vmem:[#allocation5 + $0xa20] sm:$0xff]  ;;  %v431_v63 = vld [vmem:[#allocation5 + $0xaa8] sm:$0xff] }
  0xb0   :  { %978 = vmatpush.msra.mxu2 %v381_v0  ;;  %997 = vmatpush.msra.mxu3 %v398_v1  ;;  %v446_v0 = vld [vmem:[#allocation5 + $0xb20] sm:$0xff]  ;;  %v463_v1 = vld [vmem:[#allocation5 + $0xba8] sm:$0xff] }
  0xb1   :  { %939 = vmatpush.msra.mxu0 %v348_v2  ;;  %958 = vmatpush.msra.mxu1 %v365_v3  ;;  %v413_v2 = vld [vmem:[#allocation5 + $0xa18] sm:$0xff]  ;;  %v430_v3 = vld [vmem:[#allocation5 + $0xaa0] sm:$0xff] }
  0xb2   :  { %979 = vmatpush.msra.mxu2 %v380_v4  ;;  %998 = vmatpush.msra.mxu3 %v397_v5  ;;  %v445_v4 = vld [vmem:[#allocation5 + $0xb18] sm:$0xff]  ;;  %v462_v5 = vld [vmem:[#allocation5 + $0xba0] sm:$0xff] }
  0xb3   :  { %940 = vmatpush.msra.mxu0 %v347_v6  ;;  %959 = vmatpush.msra.mxu1 %v364_v7  ;;  %v412_v6 = vld [vmem:[#allocation5 + $0xa10] sm:$0xff]  ;;  %v429_v7 = vld [vmem:[#allocation5 + $0xa98] sm:$0xff] }
  0xb4   :  { %980 = vmatpush.msra.mxu2 %v379_v8  ;;  %999 = vmatpush.msra.mxu3 %v396_v9  ;;  %v444_v8 = vld [vmem:[#allocation5 + $0xb10] sm:$0xff]  ;;  %v461_v9 = vld [vmem:[#allocation5 + $0xb98] sm:$0xff] }
  0xb5   :  { %941 = vmatpush.msra.mxu0 %v346_v10  ;;  %960 = vmatpush.msra.mxu1 %v363_v11  ;;  %v411_v10 = vld [vmem:[#allocation5 + $0xa08] sm:$0xff]  ;;  %v428_v11 = vld [vmem:[#allocation5 + $0xa90] sm:$0xff] }
  0xb6   :  { %981 = vmatpush.msra.mxu2 %v378_v12  ;;  %1000 = vmatpush.msra.mxu3 %v395_v13  ;;  %v443_v12 = vld [vmem:[#allocation5 + $0xb08] sm:$0xff]  ;;  %v460_v13 = vld [vmem:[#allocation5 + $0xb90] sm:$0xff] }
  0xb7   :  { %942 = vmatmul.f32.vlgmr.msra.gmra.mxu0 %v74_v14  ;;  %982 = vmatmul.f32.vlgmr.msra.gmra.mxu2 %v76_v15  ;;  %v410_v14 = vld [vmem:[#allocation5 + $0xa00] sm:$0xff]  ;;  %v427_v15 = vld [vmem:[#allocation5 + $0xa88] sm:$0xff] }
  0xb8   :  { %1006 = vmatpush.msrb.mxu0 %v425_v16  ;;  %1046 = vmatpush.msrb.mxu2 %v457_v17  ;;  %v442_v16 = vld [vmem:[#allocation5 + $0xb00] sm:$0xff]  ;;  %v459_v17 = vld [vmem:[#allocation5 + $0xb88] sm:$0xff] }
  0xb9   :  { %961 = vmatpush.msra.mxu1 %v362_v18  ;;  %1001 = vmatpush.msra.mxu3 %v394_v19  ;;  %v78_v18 = vld [vmem:[#allocation2 + $0xa0] sm:$0xff]  ;;  %v80_v19 = vld [vmem:[#allocation2 + $0xb0] sm:$0xff] }
  0xba   :  { %962 = vmatmul.f32.vlgmr.msra.gmra.mxu1 %v75_v20  ;;  %1002 = vmatmul.f32.vlgmr.msra.gmra.mxu3 %v77_v21  ;;  %v489_v20 = vld [vmem:[#allocation5 + $0xc78] sm:$0xff] }
  0xbb   :  { %1007 = vmatpush.msrb.mxu0 %v424_v22  ;;  %1026 = vmatpush.msrb.mxu1 %v441_v23  ;;  %v521_v21 = vld [vmem:[#allocation5 + $0xd78] sm:$0xff]  ;;  %v426_v22 = vld [vmem:[#allocation5 + $0xa80] sm:$0xff] }
  0xbc   :  { %1047 = vmatpush.msrb.mxu2 %v456_v24  ;;  %1066 = vmatpush.msrb.mxu3 %v473_v25  ;;  %v458_v23 = vld [vmem:[#allocation5 + $0xb80] sm:$0xff]  ;;  %v79_v24 = vld [vmem:[#allocation2 + $0xa8] sm:$0xff]  ;;  %v81_v25 = vld [vmem:[#allocation2 + $0xb8] sm:$0xff] }
  0xbd   :  { %1008 = vmatpush.msrb.mxu0 %v423_v26  ;;  %1027 = vmatpush.msrb.mxu1 %v440_v27  ;;  %v488_v26 = vld [vmem:[#allocation5 + $0xc70] sm:$0xff]  ;;  %v505_v27 = vld [vmem:[#allocation5 + $0xcf8] sm:$0xff] }
  0xbe   :  { %1048 = vmatpush.msrb.mxu2 %v455_v28  ;;  %1067 = vmatpush.msrb.mxu3 %v472_v29  ;;  %v520_v28 = vld [vmem:[#allocation5 + $0xd70] sm:$0xff]  ;;  %v537_v29 = vld [vmem:[#allocation5 + $0xdf8] sm:$0xff] }
  0xbf   :  { %1009 = vmatpush.msrb.mxu0 %v422_v30  ;;  %1028 = vmatpush.msrb.mxu1 %v439_v31  ;;  %v487_v30 = vld [vmem:[#allocation5 + $0xc68] sm:$0xff]  ;;  %v504_v31 = vld [vmem:[#allocation5 + $0xcf0] sm:$0xff] }
  0xc0   :  { %1049 = vmatpush.msrb.mxu2 %v454_v32  ;;  %1068 = vmatpush.msrb.mxu3 %v471_v33  ;;  %v519_v32 = vld [vmem:[#allocation5 + $0xd68] sm:$0xff]  ;;  %v536_v33 = vld [vmem:[#allocation5 + $0xdf0] sm:$0xff] }
  0xc1   :  { %1010 = vmatpush.msrb.mxu0 %v421_v34  ;;  %1029 = vmatpush.msrb.mxu1 %v438_v35  ;;  %v486_v34 = vld [vmem:[#allocation5 + $0xc60] sm:$0xff]  ;;  %v503_v35 = vld [vmem:[#allocation5 + $0xce8] sm:$0xff] }
  0xc2   :  { %1050 = vmatpush.msrb.mxu2 %v453_v36  ;;  %1069 = vmatpush.msrb.mxu3 %v470_v37  ;;  %v518_v36 = vld [vmem:[#allocation5 + $0xd60] sm:$0xff]  ;;  %v535_v37 = vld [vmem:[#allocation5 + $0xde8] sm:$0xff] }
  0xc3   :  { %1011 = vmatpush.msrb.mxu0 %v420_v38  ;;  %1030 = vmatpush.msrb.mxu1 %v437_v39  ;;  %v485_v38 = vld [vmem:[#allocation5 + $0xc58] sm:$0xff]  ;;  %v502_v39 = vld [vmem:[#allocation5 + $0xce0] sm:$0xff] }
  0xc4   :  { %1051 = vmatpush.msrb.mxu2 %v452_v40  ;;  %1070 = vmatpush.msrb.mxu3 %v469_v41  ;;  %v517_v40 = vld [vmem:[#allocation5 + $0xd58] sm:$0xff]  ;;  %v534_v41 = vld [vmem:[#allocation5 + $0xde0] sm:$0xff] }
  0xc5   :  { %1012 = vmatpush.msrb.mxu0 %v419_v42  ;;  %1031 = vmatpush.msrb.mxu1 %v436_v43  ;;  %v484_v42 = vld [vmem:[#allocation5 + $0xc50] sm:$0xff]  ;;  %v501_v43 = vld [vmem:[#allocation5 + $0xcd8] sm:$0xff] }
  0xc6   :  { %1052 = vmatpush.msrb.mxu2 %v451_v44  ;;  %1071 = vmatpush.msrb.mxu3 %v468_v45  ;;  %v516_v44 = vld [vmem:[#allocation5 + $0xd50] sm:$0xff]  ;;  %v533_v45 = vld [vmem:[#allocation5 + $0xdd8] sm:$0xff] }
  0xc7   :  { %1013 = vmatpush.msrb.mxu0 %v418_v46  ;;  %1032 = vmatpush.msrb.mxu1 %v435_v47  ;;  %v483_v46 = vld [vmem:[#allocation5 + $0xc48] sm:$0xff]  ;;  %v500_v47 = vld [vmem:[#allocation5 + $0xcd0] sm:$0xff] }
  0xc8   :  { %1053 = vmatpush.msrb.mxu2 %v450_v48  ;;  %1072 = vmatpush.msrb.mxu3 %v467_v49  ;;  %v515_v48 = vld [vmem:[#allocation5 + $0xd48] sm:$0xff]  ;;  %v532_v49 = vld [vmem:[#allocation5 + $0xdd0] sm:$0xff] }
  0xc9   :  { %1014 = vmatpush.msrb.mxu0 %v417_v50  ;;  %1033 = vmatpush.msrb.mxu1 %v434_v51  ;;  %v482_v50 = vld [vmem:[#allocation5 + $0xc40] sm:$0xff]  ;;  %v499_v51 = vld [vmem:[#allocation5 + $0xcc8] sm:$0xff] }
  0xca   :  { %1054 = vmatpush.msrb.mxu2 %v449_v52  ;;  %1073 = vmatpush.msrb.mxu3 %v466_v53  ;;  %v514_v52 = vld [vmem:[#allocation5 + $0xd40] sm:$0xff]  ;;  %v531_v53 = vld [vmem:[#allocation5 + $0xdc8] sm:$0xff] }
  0xcb   :  { %1015 = vmatpush.msrb.mxu0 %v416_v54  ;;  %1034 = vmatpush.msrb.mxu1 %v433_v55  ;;  %v481_v54 = vld [vmem:[#allocation5 + $0xc38] sm:$0xff]  ;;  %v498_v55 = vld [vmem:[#allocation5 + $0xcc0] sm:$0xff] }
  0xcc   :  { %1055 = vmatpush.msrb.mxu2 %v448_v56  ;;  %1074 = vmatpush.msrb.mxu3 %v465_v57  ;;  %v513_v56 = vld [vmem:[#allocation5 + $0xd38] sm:$0xff]  ;;  %v530_v57 = vld [vmem:[#allocation5 + $0xdc0] sm:$0xff] }
  0xcd   :  { %1016 = vmatpush.msrb.mxu0 %v415_v58  ;;  %1035 = vmatpush.msrb.mxu1 %v432_v59  ;;  %v480_v58 = vld [vmem:[#allocation5 + $0xc30] sm:$0xff]  ;;  %v497_v59 = vld [vmem:[#allocation5 + $0xcb8] sm:$0xff] }
  0xce   :  { %1056 = vmatpush.msrb.mxu2 %v447_v60  ;;  %1075 = vmatpush.msrb.mxu3 %v464_v61  ;;  %v512_v60 = vld [vmem:[#allocation5 + $0xd30] sm:$0xff]  ;;  %v529_v61 = vld [vmem:[#allocation5 + $0xdb8] sm:$0xff] }
  0xcf   :  { %1017 = vmatpush.msrb.mxu0 %v414_v62  ;;  %1036 = vmatpush.msrb.mxu1 %v431_v63  ;;  %v479_v62 = vld [vmem:[#allocation5 + $0xc28] sm:$0xff]  ;;  %v496_v63 = vld [vmem:[#allocation5 + $0xcb0] sm:$0xff] }
  0xd0   :  { %1057 = vmatpush.msrb.mxu2 %v446_v0  ;;  %1076 = vmatpush.msrb.mxu3 %v463_v1  ;;  %v511_v0 = vld [vmem:[#allocation5 + $0xd28] sm:$0xff]  ;;  %v528_v1 = vld [vmem:[#allocation5 + $0xdb0] sm:$0xff] }
  0xd1   :  { %1018 = vmatpush.msrb.mxu0 %v413_v2  ;;  %1037 = vmatpush.msrb.mxu1 %v430_v3  ;;  %v478_v2 = vld [vmem:[#allocation5 + $0xc20] sm:$0xff]  ;;  %v495_v3 = vld [vmem:[#allocation5 + $0xca8] sm:$0xff] }
  0xd2   :  { %1058 = vmatpush.msrb.mxu2 %v445_v4  ;;  %1077 = vmatpush.msrb.mxu3 %v462_v5  ;;  %v510_v4 = vld [vmem:[#allocation5 + $0xd20] sm:$0xff]  ;;  %v527_v5 = vld [vmem:[#allocation5 + $0xda8] sm:$0xff] }
  0xd3   :  { %1019 = vmatpush.msrb.mxu0 %v412_v6  ;;  %1038 = vmatpush.msrb.mxu1 %v429_v7  ;;  %v477_v6 = vld [vmem:[#allocation5 + $0xc18] sm:$0xff]  ;;  %v494_v7 = vld [vmem:[#allocation5 + $0xca0] sm:$0xff] }
  0xd4   :  { %1059 = vmatpush.msrb.mxu2 %v444_v8  ;;  %1078 = vmatpush.msrb.mxu3 %v461_v9  ;;  %v509_v8 = vld [vmem:[#allocation5 + $0xd18] sm:$0xff]  ;;  %v526_v9 = vld [vmem:[#allocation5 + $0xda0] sm:$0xff] }
  0xd5   :  { %1020 = vmatpush.msrb.mxu0 %v411_v10  ;;  %1039 = vmatpush.msrb.mxu1 %v428_v11  ;;  %v476_v10 = vld [vmem:[#allocation5 + $0xc10] sm:$0xff]  ;;  %v493_v11 = vld [vmem:[#allocation5 + $0xc98] sm:$0xff] }
  0xd6   :  { %1060 = vmatpush.msrb.mxu2 %v443_v12  ;;  %1079 = vmatpush.msrb.mxu3 %v460_v13  ;;  %v508_v12 = vld [vmem:[#allocation5 + $0xd10] sm:$0xff]  ;;  %v525_v13 = vld [vmem:[#allocation5 + $0xd98] sm:$0xff] }
  0xd7   :  { %1021 = vmatpush.msrb.mxu0 %v410_v14  ;;  %1040 = vmatpush.msrb.mxu1 %v427_v15  ;;  %v475_v14 = vld [vmem:[#allocation5 + $0xc08] sm:$0xff]  ;;  %v492_v15 = vld [vmem:[#allocation5 + $0xc90] sm:$0xff] }
  0xd8   :  { %1061 = vmatpush.msrb.mxu2 %v442_v16  ;;  %1080 = vmatpush.msrb.mxu3 %v459_v17  ;;  %v507_v16 = vld [vmem:[#allocation5 + $0xd08] sm:$0xff]  ;;  %v524_v17 = vld [vmem:[#allocation5 + $0xd90] sm:$0xff] }
  0xd9   :  { %1022 = vmatmul.f32.vlgmr.msrb.gmra.mxu0 %v78_v18  ;;  %1062 = vmatmul.f32.vlgmr.msrb.gmra.mxu2 %v80_v19  ;;  %v474_v18 = vld [vmem:[#allocation5 + $0xc00] sm:$0xff]  ;;  %v491_v19 = vld [vmem:[#allocation5 + $0xc88] sm:$0xff] }
  0xda   :  { %1086 = vmatpush.msra.mxu0 %v489_v20  ;;  %1126 = vmatpush.msra.mxu2 %v521_v21  ;;  %v506_v20 = vld [vmem:[#allocation5 + $0xd00] sm:$0xff]  ;;  %v523_v21 = vld [vmem:[#allocation5 + $0xd88] sm:$0xff] }
  0xdb   :  { %1041 = vmatpush.msrb.mxu1 %v426_v22  ;;  %1081 = vmatpush.msrb.mxu3 %v458_v23  ;;  %v82_v22 = vld [vmem:[#allocation2 + $0xc0] sm:$0xff]  ;;  %v84_v23 = vld [vmem:[#allocation2 + $0xd0] sm:$0xff] }
  0xdc   :  { %1042 = vmatmul.f32.vlgmr.msrb.gmra.mxu1 %v79_v24  ;;  %1082 = vmatmul.f32.vlgmr.msrb.gmra.mxu3 %v81_v25  ;;  %v553_v24 = vld [vmem:[#allocation5 + $0xe78] sm:$0xff] }
  0xdd   :  { %1087 = vmatpush.msra.mxu0 %v488_v26  ;;  %1106 = vmatpush.msra.mxu1 %v505_v27  ;;  %v585_v25 = vld [vmem:[#allocation5 + $0xf78] sm:$0xff]  ;;  %v490_v26 = vld [vmem:[#allocation5 + $0xc80] sm:$0xff] }
  0xde   :  { %1127 = vmatpush.msra.mxu2 %v520_v28  ;;  %1146 = vmatpush.msra.mxu3 %v537_v29  ;;  %v522_v27 = vld [vmem:[#allocation5 + $0xd80] sm:$0xff]  ;;  %v83_v28 = vld [vmem:[#allocation2 + $0xc8] sm:$0xff]  ;;  %v85_v29 = vld [vmem:[#allocation2 + $0xd8] sm:$0xff] }
  0xdf   :  { %1088 = vmatpush.msra.mxu0 %v487_v30  ;;  %1107 = vmatpush.msra.mxu1 %v504_v31  ;;  %v552_v30 = vld [vmem:[#allocation5 + $0xe70] sm:$0xff]  ;;  %v569_v31 = vld [vmem:[#allocation5 + $0xef8] sm:$0xff] }
  0xe0   :  { %1128 = vmatpush.msra.mxu2 %v519_v32  ;;  %1147 = vmatpush.msra.mxu3 %v536_v33  ;;  %v584_v32 = vld [vmem:[#allocation5 + $0xf70] sm:$0xff]  ;;  %v601_v33 = vld [vmem:[#allocation5 + $0xff8] sm:$0xff] }
  0xe1   :  { %1089 = vmatpush.msra.mxu0 %v486_v34  ;;  %1108 = vmatpush.msra.mxu1 %v503_v35  ;;  %v551_v34 = vld [vmem:[#allocation5 + $0xe68] sm:$0xff]  ;;  %v568_v35 = vld [vmem:[#allocation5 + $0xef0] sm:$0xff] }
  0xe2   :  { %1129 = vmatpush.msra.mxu2 %v518_v36  ;;  %1148 = vmatpush.msra.mxu3 %v535_v37  ;;  %v583_v36 = vld [vmem:[#allocation5 + $0xf68] sm:$0xff]  ;;  %v600_v37 = vld [vmem:[#allocation5 + $0xff0] sm:$0xff] }
  0xe3   :  { %1090 = vmatpush.msra.mxu0 %v485_v38  ;;  %1109 = vmatpush.msra.mxu1 %v502_v39  ;;  %v550_v38 = vld [vmem:[#allocation5 + $0xe60] sm:$0xff]  ;;  %v567_v39 = vld [vmem:[#allocation5 + $0xee8] sm:$0xff] }
  0xe4   :  { %1130 = vmatpush.msra.mxu2 %v517_v40  ;;  %1149 = vmatpush.msra.mxu3 %v534_v41  ;;  %v582_v40 = vld [vmem:[#allocation5 + $0xf60] sm:$0xff]  ;;  %v599_v41 = vld [vmem:[#allocation5 + $0xfe8] sm:$0xff] }
  0xe5   :  { %1091 = vmatpush.msra.mxu0 %v484_v42  ;;  %1110 = vmatpush.msra.mxu1 %v501_v43  ;;  %v549_v42 = vld [vmem:[#allocation5 + $0xe58] sm:$0xff]  ;;  %v566_v43 = vld [vmem:[#allocation5 + $0xee0] sm:$0xff] }
  0xe6   :  { %1131 = vmatpush.msra.mxu2 %v516_v44  ;;  %1150 = vmatpush.msra.mxu3 %v533_v45  ;;  %v581_v44 = vld [vmem:[#allocation5 + $0xf58] sm:$0xff]  ;;  %v598_v45 = vld [vmem:[#allocation5 + $0xfe0] sm:$0xff] }
  0xe7   :  { %1092 = vmatpush.msra.mxu0 %v483_v46  ;;  %1111 = vmatpush.msra.mxu1 %v500_v47  ;;  %v548_v46 = vld [vmem:[#allocation5 + $0xe50] sm:$0xff]  ;;  %v565_v47 = vld [vmem:[#allocation5 + $0xed8] sm:$0xff] }
  0xe8   :  { %1132 = vmatpush.msra.mxu2 %v515_v48  ;;  %1151 = vmatpush.msra.mxu3 %v532_v49  ;;  %v580_v48 = vld [vmem:[#allocation5 + $0xf50] sm:$0xff]  ;;  %v597_v49 = vld [vmem:[#allocation5 + $0xfd8] sm:$0xff] }
  0xe9   :  { %1093 = vmatpush.msra.mxu0 %v482_v50  ;;  %1112 = vmatpush.msra.mxu1 %v499_v51  ;;  %v547_v50 = vld [vmem:[#allocation5 + $0xe48] sm:$0xff]  ;;  %v564_v51 = vld [vmem:[#allocation5 + $0xed0] sm:$0xff] }
  0xea   :  { %1133 = vmatpush.msra.mxu2 %v514_v52  ;;  %1152 = vmatpush.msra.mxu3 %v531_v53  ;;  %v579_v52 = vld [vmem:[#allocation5 + $0xf48] sm:$0xff]  ;;  %v596_v53 = vld [vmem:[#allocation5 + $0xfd0] sm:$0xff] }
  0xeb   :  { %1094 = vmatpush.msra.mxu0 %v481_v54  ;;  %1113 = vmatpush.msra.mxu1 %v498_v55  ;;  %v546_v54 = vld [vmem:[#allocation5 + $0xe40] sm:$0xff]  ;;  %v563_v55 = vld [vmem:[#allocation5 + $0xec8] sm:$0xff] }
  0xec   :  { %1134 = vmatpush.msra.mxu2 %v513_v56  ;;  %1153 = vmatpush.msra.mxu3 %v530_v57  ;;  %v578_v56 = vld [vmem:[#allocation5 + $0xf40] sm:$0xff]  ;;  %v595_v57 = vld [vmem:[#allocation5 + $0xfc8] sm:$0xff] }
  0xed   :  { %1095 = vmatpush.msra.mxu0 %v480_v58  ;;  %1114 = vmatpush.msra.mxu1 %v497_v59  ;;  %v545_v58 = vld [vmem:[#allocation5 + $0xe38] sm:$0xff]  ;;  %v562_v59 = vld [vmem:[#allocation5 + $0xec0] sm:$0xff] }
  0xee   :  { %1135 = vmatpush.msra.mxu2 %v512_v60  ;;  %1154 = vmatpush.msra.mxu3 %v529_v61  ;;  %v577_v60 = vld [vmem:[#allocation5 + $0xf38] sm:$0xff]  ;;  %v594_v61 = vld [vmem:[#allocation5 + $0xfc0] sm:$0xff] }
  0xef   :  { %1096 = vmatpush.msra.mxu0 %v479_v62  ;;  %1115 = vmatpush.msra.mxu1 %v496_v63  ;;  %v544_v62 = vld [vmem:[#allocation5 + $0xe30] sm:$0xff]  ;;  %v561_v63 = vld [vmem:[#allocation5 + $0xeb8] sm:$0xff] }
  0xf0   :  { %1136 = vmatpush.msra.mxu2 %v511_v0  ;;  %1155 = vmatpush.msra.mxu3 %v528_v1  ;;  %v576_v0 = vld [vmem:[#allocation5 + $0xf30] sm:$0xff]  ;;  %v593_v1 = vld [vmem:[#allocation5 + $0xfb8] sm:$0xff] }
  0xf1   :  { %1097 = vmatpush.msra.mxu0 %v478_v2  ;;  %1116 = vmatpush.msra.mxu1 %v495_v3  ;;  %v543_v2 = vld [vmem:[#allocation5 + $0xe28] sm:$0xff]  ;;  %v560_v3 = vld [vmem:[#allocation5 + $0xeb0] sm:$0xff] }
  0xf2   :  { %1137 = vmatpush.msra.mxu2 %v510_v4  ;;  %1156 = vmatpush.msra.mxu3 %v527_v5  ;;  %v575_v4 = vld [vmem:[#allocation5 + $0xf28] sm:$0xff]  ;;  %v592_v5 = vld [vmem:[#allocation5 + $0xfb0] sm:$0xff] }
  0xf3   :  { %1098 = vmatpush.msra.mxu0 %v477_v6  ;;  %1117 = vmatpush.msra.mxu1 %v494_v7  ;;  %v542_v6 = vld [vmem:[#allocation5 + $0xe20] sm:$0xff]  ;;  %v559_v7 = vld [vmem:[#allocation5 + $0xea8] sm:$0xff] }
  0xf4   :  { %1138 = vmatpush.msra.mxu2 %v509_v8  ;;  %1157 = vmatpush.msra.mxu3 %v526_v9  ;;  %v574_v8 = vld [vmem:[#allocation5 + $0xf20] sm:$0xff]  ;;  %v591_v9 = vld [vmem:[#allocation5 + $0xfa8] sm:$0xff] }
  0xf5   :  { %1099 = vmatpush.msra.mxu0 %v476_v10  ;;  %1118 = vmatpush.msra.mxu1 %v493_v11  ;;  %v541_v10 = vld [vmem:[#allocation5 + $0xe18] sm:$0xff]  ;;  %v558_v11 = vld [vmem:[#allocation5 + $0xea0] sm:$0xff] }
  0xf6   :  { %1139 = vmatpush.msra.mxu2 %v508_v12  ;;  %1158 = vmatpush.msra.mxu3 %v525_v13  ;;  %v573_v12 = vld [vmem:[#allocation5 + $0xf18] sm:$0xff]  ;;  %v590_v13 = vld [vmem:[#allocation5 + $0xfa0] sm:$0xff] }
  0xf7   :  { %1100 = vmatpush.msra.mxu0 %v475_v14  ;;  %1119 = vmatpush.msra.mxu1 %v492_v15  ;;  %v540_v14 = vld [vmem:[#allocation5 + $0xe10] sm:$0xff]  ;;  %v557_v15 = vld [vmem:[#allocation5 + $0xe98] sm:$0xff] }
  0xf8   :  { %1140 = vmatpush.msra.mxu2 %v507_v16  ;;  %1159 = vmatpush.msra.mxu3 %v524_v17  ;;  %v572_v16 = vld [vmem:[#allocation5 + $0xf10] sm:$0xff]  ;;  %v589_v17 = vld [vmem:[#allocation5 + $0xf98] sm:$0xff] }
  0xf9   :  { %1101 = vmatpush.msra.mxu0 %v474_v18  ;;  %1120 = vmatpush.msra.mxu1 %v491_v19  ;;  %v539_v18 = vld [vmem:[#allocation5 + $0xe08] sm:$0xff]  ;;  %v556_v19 = vld [vmem:[#allocation5 + $0xe90] sm:$0xff] }
  0xfa   :  { %1141 = vmatpush.msra.mxu2 %v506_v20  ;;  %1160 = vmatpush.msra.mxu3 %v523_v21  ;;  %v571_v20 = vld [vmem:[#allocation5 + $0xf08] sm:$0xff]  ;;  %v588_v21 = vld [vmem:[#allocation5 + $0xf90] sm:$0xff] }
  0xfb   :  { %1102 = vmatmul.f32.vlgmr.msra.gmra.mxu0 %v82_v22  ;;  %1142 = vmatmul.f32.vlgmr.msra.gmra.mxu2 %v84_v23  ;;  %v538_v22 = vld [vmem:[#allocation5 + $0xe00] sm:$0xff]  ;;  %v555_v23 = vld [vmem:[#allocation5 + $0xe88] sm:$0xff] }
  0xfc   :  { %1166 = vmatpush.msrb.mxu0 %v553_v24  ;;  %1206 = vmatpush.msrb.mxu2 %v585_v25  ;;  %v570_v24 = vld [vmem:[#allocation5 + $0xf00] sm:$0xff]  ;;  %v587_v25 = vld [vmem:[#allocation5 + $0xf88] sm:$0xff] }
  0xfd   :  { %1121 = vmatpush.msra.mxu1 %v490_v26  ;;  %1161 = vmatpush.msra.mxu3 %v522_v27  ;;  %v86_v26 = vld [vmem:[#allocation2 + $0xe0] sm:$0xff]  ;;  %v88_v27 = vld [vmem:[#allocation2 + $0xf0] sm:$0xff] }
  0xfe   :  { %1122 = vmatmul.f32.vlgmr.msra.gmra.mxu1 %v83_v28  ;;  %1162 = vmatmul.f32.vlgmr.msra.gmra.mxu3 %v85_v29  ;;  %v554_v28 = vld [vmem:[#allocation5 + $0xe80] sm:$0xff] }
  0xff   :  { %1167 = vmatpush.msrb.mxu0 %v552_v30  ;;  %1186 = vmatpush.msrb.mxu1 %v569_v31  ;;  %v586_v29 = vld [vmem:[#allocation5 + $0xf80] sm:$0xff]  ;;  %v87_v30 = vld [vmem:[#allocation2 + $0xe8] sm:$0xff]  ;;  %v89_v31 = vld [vmem:[#allocation2 + $0xf8] sm:$0xff] }
 0x100   :  { %1207 = vmatpush.msrb.mxu2 %v584_v32  ;;  %1226 = vmatpush.msrb.mxu3 %v601_v33  ;;  %v1271_v32 = vld [vmem:[#allocation7] ss:$0 sm:$0xff]  ;;  %v623_v33 = vpop.f32.mrf.mxu0 }
 0x101   :  { %1168 = vmatpush.msrb.mxu0 %v551_v34  ;;  %1187 = vmatpush.msrb.mxu1 %v568_v35  ;;  %v624_v34 = vadd.f32 %v1271_v32, %v623_v33  ;;  %v643_v35 = vpop.f32.mrf.mxu1 }
 0x102   :  { %1208 = vmatpush.msrb.mxu2 %v583_v36  ;;  %1227 = vmatpush.msrb.mxu3 %v600_v37  ;;  %v663_v37 = vpop.f32.mrf.mxu2 }
 0x103   :  { %1169 = vmatpush.msrb.mxu0 %v550_v38  ;;  %1188 = vmatpush.msrb.mxu1 %v567_v39  ;;  %v644_v36 = vadd.f32 %v643_v35, %v624_v34  ;;  %v683_v39 = vpop.f32.mrf.mxu3 }
 0x104   :  { %1209 = vmatpush.msrb.mxu2 %v582_v40  ;;  %1228 = vmatpush.msrb.mxu3 %v599_v41 }
 0x105   :  { %1170 = vmatpush.msrb.mxu0 %v549_v42  ;;  %1189 = vmatpush.msrb.mxu1 %v566_v43  ;;  %v664_v38 = vadd.f32 %v663_v37, %v644_v36 }
 0x106   :  { %1210 = vmatpush.msrb.mxu2 %v581_v44  ;;  %1229 = vmatpush.msrb.mxu3 %v598_v45 }
 0x107   :  { %1171 = vmatpush.msrb.mxu0 %v548_v46  ;;  %1190 = vmatpush.msrb.mxu1 %v565_v47  ;;  %v684_v40 = vadd.f32 %v683_v39, %v664_v38 }
 0x108   :  { %1211 = vmatpush.msrb.mxu2 %v580_v48  ;;  %1230 = vmatpush.msrb.mxu3 %v597_v49  ;;  %v703_v41 = vpop.f32.mrf.mxu0 }
 0x109   :  { %1172 = vmatpush.msrb.mxu0 %v547_v50  ;;  %1191 = vmatpush.msrb.mxu1 %v564_v51  ;;  %v704_v42 = vadd.f32 %v703_v41, %v684_v40  ;;  %v723_v43 = vpop.f32.mrf.mxu1 }
 0x10a   :  { %1212 = vmatpush.msrb.mxu2 %v579_v52  ;;  %1231 = vmatpush.msrb.mxu3 %v596_v53  ;;  %v743_v45 = vpop.f32.mrf.mxu2 }
 0x10b   :  { %1173 = vmatpush.msrb.mxu0 %v546_v54  ;;  %1192 = vmatpush.msrb.mxu1 %v563_v55  ;;  %v724_v44 = vadd.f32 %v723_v43, %v704_v42  ;;  %v763_v47 = vpop.f32.mrf.mxu3 }
 0x10c   :  { %1213 = vmatpush.msrb.mxu2 %v578_v56  ;;  %1232 = vmatpush.msrb.mxu3 %v595_v57 }
 0x10d   :  { %1174 = vmatpush.msrb.mxu0 %v545_v58  ;;  %1193 = vmatpush.msrb.mxu1 %v562_v59  ;;  %v744_v46 = vadd.f32 %v743_v45, %v724_v44 }
 0x10e   :  { %1214 = vmatpush.msrb.mxu2 %v577_v60  ;;  %1233 = vmatpush.msrb.mxu3 %v594_v61 }
 0x10f   :  { %1175 = vmatpush.msrb.mxu0 %v544_v62  ;;  %1194 = vmatpush.msrb.mxu1 %v561_v63  ;;  %v764_v49 = vadd.f32 %v763_v47, %v744_v46 }
 0x110   :  { %1215 = vmatpush.msrb.mxu2 %v576_v0  ;;  %1234 = vmatpush.msrb.mxu3 %v593_v1  ;;  %v783_v48 = vpop.f32.mrf.mxu0 }
 0x111   :  { %1176 = vmatpush.msrb.mxu0 %v543_v2  ;;  %1195 = vmatpush.msrb.mxu1 %v560_v3  ;;  %v784_v50 = vadd.f32 %v783_v48, %v764_v49  ;;  %v803_v51 = vpop.f32.mrf.mxu1 }
 0x112   :  { %1216 = vmatpush.msrb.mxu2 %v575_v4  ;;  %1235 = vmatpush.msrb.mxu3 %v592_v5  ;;  %v823_v52 = vpop.f32.mrf.mxu2 }
 0x113   :  { %1177 = vmatpush.msrb.mxu0 %v542_v6  ;;  %1196 = vmatpush.msrb.mxu1 %v559_v7  ;;  %v804_v53 = vadd.f32 %v803_v51, %v784_v50  ;;  %v843_v55 = vpop.f32.mrf.mxu3 }
 0x114   :  { %1217 = vmatpush.msrb.mxu2 %v574_v8  ;;  %1236 = vmatpush.msrb.mxu3 %v591_v9 }
 0x115   :  { %1178 = vmatpush.msrb.mxu0 %v541_v10  ;;  %1197 = vmatpush.msrb.mxu1 %v558_v11  ;;  %v824_v54 = vadd.f32 %v823_v52, %v804_v53 }
 0x116   :  { %1218 = vmatpush.msrb.mxu2 %v573_v12  ;;  %1237 = vmatpush.msrb.mxu3 %v590_v13 }
 0x117   :  { %1179 = vmatpush.msrb.mxu0 %v540_v14  ;;  %1198 = vmatpush.msrb.mxu1 %v557_v15  ;;  %v844_v57 = vadd.f32 %v843_v55, %v824_v54 }
 0x118   :  { %1219 = vmatpush.msrb.mxu2 %v572_v16  ;;  %1238 = vmatpush.msrb.mxu3 %v589_v17  ;;  %v863_v56 = vpop.f32.mrf.mxu0 }
 0x119   :  { %1180 = vmatpush.msrb.mxu0 %v539_v18  ;;  %1199 = vmatpush.msrb.mxu1 %v556_v19  ;;  %v864_v58 = vadd.f32 %v863_v56, %v844_v57  ;;  %v883_v59 = vpop.f32.mrf.mxu1 }
 0x11a   :  { %1220 = vmatpush.msrb.mxu2 %v571_v20  ;;  %1239 = vmatpush.msrb.mxu3 %v588_v21  ;;  %v903_v60 = vpop.f32.mrf.mxu2 }
 0x11b   :  { %1181 = vmatpush.msrb.mxu0 %v538_v22  ;;  %1200 = vmatpush.msrb.mxu1 %v555_v23  ;;  %v884_v61 = vadd.f32 %v883_v59, %v864_v58  ;;  %v923_v63 = vpop.f32.mrf.mxu3 }
 0x11c   :  { %1221 = vmatpush.msrb.mxu2 %v570_v24  ;;  %1240 = vmatpush.msrb.mxu3 %v587_v25 }
 0x11d   :  { %1182 = vmatmul.f32.vlgmr.msrb.gmra.mxu0 %v86_v26  ;;  %1222 = vmatmul.f32.vlgmr.msrb.gmra.mxu2 %v88_v27  ;;  %v904_v62 = vadd.f32 %v903_v60, %v884_v61 }
 0x11e   :  { %1201 = vmatpush.msrb.mxu1 %v554_v28  ;;  %1241 = vmatpush.msrb.mxu3 %v586_v29 }
 0x11f   :  { %1202 = vmatmul.f32.vlgmr.msrb.gmra.mxu1 %v87_v30  ;;  %1242 = vmatmul.f32.vlgmr.msrb.gmra.mxu3 %v89_v31  ;;  %v924_v1 = vadd.f32 %v923_v63, %v904_v62 }
 0x134   :  { %v943_v0 = vpop.f32.mrf.mxu0 }
 0x135   :  { %v944_v2 = vadd.f32 %v943_v0, %v924_v1 }
 0x137   :  { %v963_v3 = vpop.f32.mrf.mxu1 }
 0x138   :  { %v964_v5 = vadd.f32 %v963_v3, %v944_v2 }
 0x13a   :  { %v983_v4 = vpop.f32.mrf.mxu2 }
 0x13b   :  { %v984_v6 = vadd.f32 %v983_v4, %v964_v5 }
 0x13d   :  { %v1003_v7 = vpop.f32.mrf.mxu3 }
 0x13e   :  { %v1004_v9 = vadd.f32 %v1003_v7, %v984_v6 }
 0x156   :  { %v1023_v8 = vpop.f32.mrf.mxu0 }
 0x157   :  { %v1024_v10 = vadd.f32 %v1023_v8, %v1004_v9 }
 0x159   :  { %v1043_v11 = vpop.f32.mrf.mxu1 }
 0x15a   :  { %v1044_v13 = vadd.f32 %v1043_v11, %v1024_v10 }
 0x15c   :  { %v1063_v12 = vpop.f32.mrf.mxu2 }
 0x15d   :  { %v1064_v14 = vadd.f32 %v1063_v12, %v1044_v13 }
 0x15f   :  { %v1083_v15 = vpop.f32.mrf.mxu3 }
 0x160   :  { %v1084_v17 = vadd.f32 %v1083_v15, %v1064_v14 }
 0x178   :  { %v1103_v16 = vpop.f32.mrf.mxu0 }
 0x179   :  { %v1104_v18 = vadd.f32 %v1103_v16, %v1084_v17 }
 0x17b   :  { %v1123_v19 = vpop.f32.mrf.mxu1 }
 0x17c   :  { %v1124_v21 = vadd.f32 %v1123_v19, %v1104_v18 }
 0x17e   :  { %v1143_v20 = vpop.f32.mrf.mxu2 }
 0x17f   :  { %v1144_v22 = vadd.f32 %v1143_v20, %v1124_v21 }
 0x181   :  { %v1163_v23 = vpop.f32.mrf.mxu3 }
 0x182   :  { %v1164_v24 = vadd.f32 %v1163_v23, %v1144_v22 }
 0x19a   :  { %v1183_v25 = vpop.f32.mrf.mxu0 }
 0x19b   :  { %v1184_v26 = vadd.f32 %v1183_v25, %v1164_v24 }
 0x19c   :  { %v1203_v27 = vpop.f32.mrf.mxu1 }
 0x19d   :  { %v1204_v28 = vadd.f32 %v1203_v27, %v1184_v26 }
 0x1a0   :  { %v1223_v29 = vpop.f32.mrf.mxu2 }
 0x1a1   :  { %v1224_v30 = vadd.f32 %v1223_v29, %v1204_v28 }
 0x1a2   :  { %v1243_v31 = vpop.f32.mrf.mxu3 }
 0x1a3   :  { %v1244_v32 = vadd.f32 %v1243_v31, %v1224_v30 }
 0x1a5   :  { %1246 = vst [vmem:[#allocation8] sm:$0xff] %v1244_v32 }
 0x1a6   :  { %1257 = dma.vmem_to_hbm [thread:$0]  %s1253_s2, 128, %s1255_s30, [#allocation4]  }
 0x1a7   :  { %1372 = dma.done.wait [#allocation4], 128  }
 0x1a8   :  { %1373 = vsyncadd [#allocation4], 4294967168 }
 0x1a9   :  { %1262 = vsyncpa [#allocation3], 1 }
 0x1aa   :  { %1263 = vsyncpa [#allocation6], 1 }
 0x1ab   :  { %1264 = vsyncpa [#allocation4], 1 }

</bundles_post_ra>
